<compile_context>
chip_gen: v6e
topology: v6e:2x2x1
jax: 0.10.0
libtpu: 0.0.40
codegen_flags: <defaults>
</compile_context>

<pallas_src>
import math
import functools

import jax
import jax.numpy as jnp
import numpy as np
from jax.experimental import pallas as pl
from jax.experimental.pallas import tpu as pltpu

# ---------------- model hyper-parameters (small, consistent w/ module) ------
N_BATCH = 2
SEQ = 8
EMBED = 32
HEADS = 4
HEAD_DIM = EMBED // HEADS
FWD_EXP = 4
HIDDEN = FWD_EXP * EMBED
LN_EPS = 1e-5


# ---------------------------- Pallas kernel ---------------------------------
def transformer_block_kernel(
    q_ref, k_ref, v_ref,      # (N*S, E) each
    mask_ref,                 # (N, S, S)
    wp_ref,                   # (4, E, E): [Wq_bd * 1/sqrt(E), Wk_bd, Wv_bd, Wfc.T]
    w1_ref,                   # (E, HIDDEN) = W1.T
    w2_ref,                   # (HIDDEN, E) = W2.T
    vece_ref,                 # (6, E): [bfc, g1, be1, bb2, g2, be2]
    bb1_ref,                  # (1, HIDDEN)
    out_ref,                  # (N*S, E)
    *, n_batch, seq, heads, head_dim,
):
    q_all = q_ref[...]        # (N*S, E)
    k_all = k_ref[...]
    v_all = v_ref[...]

    wq = wp_ref[0]            # (E, E), 1/sqrt(E) already folded in
    wk = wp_ref[1]
    wv = wp_ref[2]
    wfc = wp_ref[3]           # (E, E) = Wfc.T

    # Per-head bias-free projections as one block-diagonal matmul over the
    # whole folded batch.
    q_proj = jnp.dot(q_all, wq, preferred_element_type=jnp.float32)
    k_proj = jnp.dot(k_all, wk, preferred_element_type=jnp.float32)
    v_proj = jnp.dot(v_all, wv, preferred_element_type=jnp.float32)

    bfc = vece_ref[0:1, :]
    g1 = vece_ref[1:2, :]
    be1 = vece_ref[2:3, :]
    bb2 = vece_ref[3:4, :]
    g2 = vece_ref[4:5, :]
    be2 = vece_ref[5:6, :]

    # Scaled-dot-product attention with fused fc_out (per-head accumulation,
    # no lane-axis concat). n_batch/heads are small compile-time constants.
    batch_rows = []
    for n in range(n_batch):
        mask_n = mask_ref[n]                                    # (S, S)
        # mirrors masked_fill(mask == 0, -1e20) of the PyTorch module
        neg_bias = jnp.where(mask_n == 0.0,
                             jnp.float32(-1e20), jnp.float32(0.0))
        r0 = n * seq
        acc = None
        for h in range(heads):
            c0 = h * head_dim
            qh = q_proj[r0:r0 + seq, c0:c0 + head_dim]          # (S, d)
            kh = k_proj[r0:r0 + seq, c0:c0 + head_dim]
            vh = v_proj[r0:r0 + seq, c0:c0 + head_dim]

            s = jnp.dot(qh, kh.T, preferred_element_type=jnp.float32) + neg_bias
            m = jnp.max(s, axis=-1, keepdims=True)
            e = jnp.exp(s - m)
            denom = jnp.sum(e, axis=-1, keepdims=True)
            p = e * pl.reciprocal(denom, approx=True)           # softmax (EUP)

            ho = jnp.dot(p, vh, preferred_element_type=jnp.float32)     # (S, d)
            contrib = jnp.dot(ho, wfc[c0:c0 + head_dim, :],
                              preferred_element_type=jnp.float32)       # (S, E)
            acc = contrib if acc is None else acc + contrib
        batch_rows.append(acc)

    attn_out = jnp.concatenate(batch_rows, axis=0) + bfc        # (N*S, E)

    # --- residual + LayerNorm1 (dropout = identity in eval) -----------------
    x1 = attn_out + q_all
    mu1 = jnp.mean(x1, axis=-1, keepdims=True)
    xc1 = x1 - mu1
    var1 = jnp.mean(xc1 * xc1, axis=-1, keepdims=True)
    xn1 = xc1 * jax.lax.rsqrt(var1 + LN_EPS) * g1 + be1

    # --- feed-forward: Linear -> ReLU -> Linear ------------------------------
    h1 = jnp.dot(xn1, w1_ref[...], preferred_element_type=jnp.float32) + bb1_ref[...]
    h1 = jnp.maximum(h1, 0.0)
    ff = jnp.dot(h1, w2_ref[...], preferred_element_type=jnp.float32) + bb2

    # --- residual + LayerNorm2 (dropout = identity in eval) ------------------
    x2 = ff + xn1
    mu2 = jnp.mean(x2, axis=-1, keepdims=True)
    xc2 = x2 - mu2
    var2 = jnp.mean(xc2 * xc2, axis=-1, keepdims=True)
    xn2 = xc2 * jax.lax.rsqrt(var2 + LN_EPS) * g2 + be2

    out_ref[...] = xn2.astype(out_ref.dtype)


# --------------------------- parameter packing (one-time) -------------------
def prepare_params(p):
    """Pack raw module parameters once (NOT per forward call):
    block-diagonal per-head weights, 1/sqrt(E) scale fold, stacked vectors."""
    eye = jnp.eye(HEADS, dtype=jnp.float32)
    scale = 1.0 / math.sqrt(float(EMBED))
    wq_bd = jnp.kron(eye, p["wq"].T) * scale     # fold attention scale into Q
    wk_bd = jnp.kron(eye, p["wk"].T)
    wv_bd = jnp.kron(eye, p["wv"].T)
    w_proj = jnp.stack([wq_bd, wk_bd, wv_bd, p["wfc"].T])        # (4, E, E)
    vec_e = jnp.stack([p["bfc"], p["g1"], p["be1"],
                       p["bb2"], p["g2"], p["be2"]])             # (6, E)
    return {
        "w_proj": w_proj,
        "w1_t": p["w1"].T,                       # (E, HIDDEN)
        "w2_t": p["w2"].T,                       # (HIDDEN, E)
        "vec_e": vec_e,
        "bb1": p["bb1"].reshape(1, HIDDEN),
    }


# --------------------------- wrapper ----------------------------------------
@jax.jit
def transformer_block(value, key, query, mask, prep):
    n, s, e = query.shape
    kernel = functools.partial(
        transformer_block_kernel,
        n_batch=n, seq=s, heads=HEADS, head_dim=HEAD_DIM)

    out = pl.pallas_call(
        kernel,
        out_shape=jax.ShapeDtypeStruct((n * s, e), jnp.float32),
        compiler_params=pltpu.CompilerParams(),
    )(
        query.reshape(n * s, e),
        key.reshape(n * s, e),
        value.reshape(n * s, e),
        mask,
        prep["w_proj"], prep["w1_t"], prep["w2_t"], prep["vec_e"], prep["bb1"],
    )
    return out.reshape(n, s, e)


# --------------------------- pure-JAX reference ------------------------------
def reference_forward(value, key, query, mask, p):
    n, s, e = query.shape
    hd = HEAD_DIM

    def per_head_linear(x, w):  # x: (N,S,E) -> (N,S,H,hd) @ W.T
        xr = x.reshape(n, s, HEADS, hd)
        return jnp.einsum("nshd,od->nsho", xr, w)

    v = per_head_linear(value, p["wv"])
    k = per_head_linear(key, p["wk"])
    q = per_head_linear(query, p["wq"])

    energy = jnp.einsum("nqhd,nkhd->nhqk", q, k)
    energy = jnp.where(mask[:, None, :, :] == 0.0, -1e20, energy)
    attn = jax.nn.softmax(energy / math.sqrt(float(e)), axis=3)
    out = jnp.einsum("nhqk,nkhd->nqhd", attn, v).reshape(n, s, e)
    out = out @ p["wfc"].T + p["bfc"]

    def layernorm(x, g, b):
        mu = jnp.mean(x, axis=-1, keepdims=True)
        var = jnp.mean((x - mu) ** 2, axis=-1, keepdims=True)
        return (x - mu) / jnp.sqrt(var + LN_EPS) * g + b

    x = layernorm(out + query, p["g1"], p["be1"])
    ff = jnp.maximum(x @ p["w1"].T + p["bb1"], 0.0) @ p["w2"].T + p["bb2"]
    return layernorm(ff + x, p["g2"], p["be2"])


# ------------------------------ main -----------------------------------------
if __name__ == "__main__":
    root = jax.random.PRNGKey(0)
    keys = jax.random.split(root, 12)

    params = {
        "wv": jax.random.normal(keys[0], (HEAD_DIM, HEAD_DIM), jnp.float32) * 0.1,
        "wk": jax.random.normal(keys[1], (HEAD_DIM, HEAD_DIM), jnp.float32) * 0.1,
        "wq": jax.random.normal(keys[2], (HEAD_DIM, HEAD_DIM), jnp.float32) * 0.1,
        "wfc": jax.random.normal(keys[3], (EMBED, EMBED), jnp.float32) * 0.1,
        "bfc": jax.random.normal(keys[4], (EMBED,), jnp.float32) * 0.1,
        "g1": jnp.ones((EMBED,), jnp.float32),
        "be1": jnp.zeros((EMBED,), jnp.float32),
        "w1": jax.random.normal(keys[5], (HIDDEN, EMBED), jnp.float32) * 0.1,
        "bb1": jax.random.normal(keys[6], (HIDDEN,), jnp.float32) * 0.1,
        "w2": jax.random.normal(keys[7], (EMBED, HIDDEN), jnp.float32) * 0.1,
        "bb2": jax.random.normal(keys[8], (EMBED,), jnp.float32) * 0.1,
        "g2": jnp.ones((EMBED,), jnp.float32),
        "be2": jnp.zeros((EMBED,), jnp.float32),
    }

    # one-time parameter packing (block-diag weights, scale fold, stacking)
    prepared = prepare_params(params)

    value = jax.random.normal(keys[9], (N_BATCH, SEQ, EMBED), jnp.float32)
    key_t = jax.random.normal(keys[10], (N_BATCH, SEQ, EMBED), jnp.float32)
    query = jax.random.normal(keys[11], (N_BATCH, SEQ, EMBED), jnp.float32)
    # causal-style mask, (N, q_len, k_len); 0 -> masked with -1e20
    mask = jnp.broadcast_to(
        jnp.tril(jnp.ones((SEQ, SEQ), jnp.float32)), (N_BATCH, SEQ, SEQ))

    out = transformer_block(value, key_t, query, mask, prepared)
    out = jax.block_until_ready(out)

    ref = reference_forward(value, key_t, query, mask, params)
    # tolerance allows for the EUP approximate-reciprocal softmax denominator
    np.testing.assert_allclose(np.asarray(out), np.asarray(ref),
                               rtol=2e-3, atol=2e-3)

    print("KERNEL_OK")
</pallas_src>

<mosaic_0001>
module attributes {stable_mosaic.version = 11 : i64} {
  func.func @transformer_block_kernel(%arg0: memref<16x32xf32, #tpu.memory_space<vmem>>, %arg1: memref<16x32xf32, #tpu.memory_space<vmem>>, %arg2: memref<16x32xf32, #tpu.memory_space<vmem>>, %arg3: memref<2x8x8xf32, #tpu.memory_space<vmem>>, %arg4: memref<4x32x32xf32, #tpu.memory_space<vmem>>, %arg5: memref<32x128xf32, #tpu.memory_space<vmem>>, %arg6: memref<128x32xf32, #tpu.memory_space<vmem>>, %arg7: memref<6x32xf32, #tpu.memory_space<vmem>>, %arg8: memref<1x128xf32, #tpu.memory_space<vmem>>, %arg9: memref<16x32xf32, #tpu.memory_space<vmem>>) attributes {dimension_semantics = [], scalar_prefetch = 0 : i64, scratch_operands = 0 : i64, tpu.core_type = #tpu.core_type<tc>} {
    %c0 = arith.constant 0 : index
    %c0_0 = arith.constant 0 : index
    %0 = vector.load %arg0[%c0, %c0_0] : memref<16x32xf32, #tpu.memory_space<vmem>>, vector<16x32xf32>
    %c0_1 = arith.constant 0 : index
    %c0_2 = arith.constant 0 : index
    %1 = vector.load %arg1[%c0_1, %c0_2] : memref<16x32xf32, #tpu.memory_space<vmem>>, vector<16x32xf32>
    %c0_3 = arith.constant 0 : index
    %c0_4 = arith.constant 0 : index
    %2 = vector.load %arg2[%c0_3, %c0_4] : memref<16x32xf32, #tpu.memory_space<vmem>>, vector<16x32xf32>
    %c0_5 = arith.constant 0 : index
    %c0_6 = arith.constant 0 : index
    %c0_7 = arith.constant 0 : index
    %3 = vector.load %arg4[%c0_5, %c0_6, %c0_7] : memref<4x32x32xf32, #tpu.memory_space<vmem>>, vector<1x32x32xf32>
    %4 = vector.shape_cast %3 : vector<1x32x32xf32> to vector<32x32xf32>
    %c1 = arith.constant 1 : index
    %c0_8 = arith.constant 0 : index
    %c0_9 = arith.constant 0 : index
    %5 = vector.load %arg4[%c1, %c0_8, %c0_9] : memref<4x32x32xf32, #tpu.memory_space<vmem>>, vector<1x32x32xf32>
    %6 = vector.shape_cast %5 : vector<1x32x32xf32> to vector<32x32xf32>
    %c2 = arith.constant 2 : index
    %c0_10 = arith.constant 0 : index
    %c0_11 = arith.constant 0 : index
    %7 = vector.load %arg4[%c2, %c0_10, %c0_11] : memref<4x32x32xf32, #tpu.memory_space<vmem>>, vector<1x32x32xf32>
    %8 = vector.shape_cast %7 : vector<1x32x32xf32> to vector<32x32xf32>
    %c3 = arith.constant 3 : index
    %c0_12 = arith.constant 0 : index
    %c0_13 = arith.constant 0 : index
    %9 = vector.load %arg4[%c3, %c0_12, %c0_13] : memref<4x32x32xf32, #tpu.memory_space<vmem>>, vector<1x32x32xf32>
    %10 = vector.shape_cast %9 : vector<1x32x32xf32> to vector<32x32xf32>
    %cst = arith.constant dense<0.000000e+00> : vector<16x32xf32>
    %11 = tpu.matmul %0, %4, %cst {dimension_numbers = #tpu.dot_dimension_numbers<[1], [0], [0], [1], [0, 0, 1, 1], [], []>} : vector<16x32xf32>, vector<32x32xf32>, vector<16x32xf32> -> vector<16x32xf32>
    %cst_14 = arith.constant dense<0.000000e+00> : vector<16x32xf32>
    %12 = tpu.matmul %1, %6, %cst_14 {dimension_numbers = #tpu.dot_dimension_numbers<[1], [0], [0], [1], [0, 0, 1, 1], [], []>} : vector<16x32xf32>, vector<32x32xf32>, vector<16x32xf32> -> vector<16x32xf32>
    %cst_15 = arith.constant dense<0.000000e+00> : vector<16x32xf32>
    %13 = tpu.matmul %2, %8, %cst_15 {dimension_numbers = #tpu.dot_dimension_numbers<[1], [0], [0], [1], [0, 0, 1, 1], [], []>} : vector<16x32xf32>, vector<32x32xf32>, vector<16x32xf32> -> vector<16x32xf32>
    %c0_16 = arith.constant 0 : index
    %c0_17 = arith.constant 0 : index
    %14 = vector.load %arg7[%c0_16, %c0_17] : memref<6x32xf32, #tpu.memory_space<vmem>>, vector<1x32xf32>
    %c1_18 = arith.constant 1 : index
    %c0_19 = arith.constant 0 : index
    %15 = vector.load %arg7[%c1_18, %c0_19] : memref<6x32xf32, #tpu.memory_space<vmem>>, vector<1x32xf32>
    %c2_20 = arith.constant 2 : index
    %c0_21 = arith.constant 0 : index
    %16 = vector.load %arg7[%c2_20, %c0_21] : memref<6x32xf32, #tpu.memory_space<vmem>>, vector<1x32xf32>
    %c3_22 = arith.constant 3 : index
    %c0_23 = arith.constant 0 : index
    %17 = vector.load %arg7[%c3_22, %c0_23] : memref<6x32xf32, #tpu.memory_space<vmem>>, vector<1x32xf32>
    %c4 = arith.constant 4 : index
    %c0_24 = arith.constant 0 : index
    %18 = vector.load %arg7[%c4, %c0_24] : memref<6x32xf32, #tpu.memory_space<vmem>>, vector<1x32xf32>
    %c5 = arith.constant 5 : index
    %c0_25 = arith.constant 0 : index
    %19 = vector.load %arg7[%c5, %c0_25] : memref<6x32xf32, #tpu.memory_space<vmem>>, vector<1x32xf32>
    %c0_26 = arith.constant 0 : index
    %c0_27 = arith.constant 0 : index
    %c0_28 = arith.constant 0 : index
    %20 = vector.load %arg3[%c0_26, %c0_27, %c0_28] : memref<2x8x8xf32, #tpu.memory_space<vmem>>, vector<1x8x8xf32>
    %21 = vector.shape_cast %20 : vector<1x8x8xf32> to vector<8x8xf32>
    %cst_29 = arith.constant 0.000000e+00 : f32
    %22 = vector.broadcast %cst_29 : f32 to vector<8x8xf32>
    %23 = arith.cmpf oeq, %21, %22 : vector<8x8xf32>
    %cst_30 = arith.constant -1.000000e+20 : f32
    %cst_31 = arith.constant 0.000000e+00 : f32
    %24 = vector.broadcast %cst_30 : f32 to vector<8x8xf32>
    %25 = vector.broadcast %cst_31 : f32 to vector<8x8xf32>
    %26 = arith.select %23, %24, %25 : vector<8x8xi1>, vector<8x8xf32>
    %27 = vector.extract_strided_slice %11 {offsets = [0, 0], sizes = [8, 8], strides = [1, 1]} : vector<16x32xf32> to vector<8x8xf32>
    %28 = vector.extract_strided_slice %12 {offsets = [0, 0], sizes = [8, 8], strides = [1, 1]} : vector<16x32xf32> to vector<8x8xf32>
    %29 = vector.extract_strided_slice %13 {offsets = [0, 0], sizes = [8, 8], strides = [1, 1]} : vector<16x32xf32> to vector<8x8xf32>
    %30 = tpu.transpose %28, [1, 0] : vector<8x8xf32> -> vector<8x8xf32>
    %cst_32 = arith.constant dense<0.000000e+00> : vector<8x8xf32>
    %31 = tpu.matmul %27, %30, %cst_32 {dimension_numbers = #tpu.dot_dimension_numbers<[1], [0], [0], [1], [0, 0, 1, 1], [], []>} : vector<8x8xf32>, vector<8x8xf32>, vector<8x8xf32> -> vector<8x8xf32>
    %32 = arith.addf %31, %26 : vector<8x8xf32>
    %cst_33 = arith.constant dense<0xFF800000> : vector<8xf32>
    %33 = vector.multi_reduction <maximumf>, %32, %cst_33 [1] : vector<8x8xf32> to vector<8xf32>
    %34 = vector.shape_cast %33 : vector<8xf32> to vector<8x1xf32>
    %35 = vector.broadcast %34 : vector<8x1xf32> to vector<8x8xf32>
    %36 = arith.subf %32, %35 : vector<8x8xf32>
    %37 = math.exp %36 : vector<8x8xf32>
    %cst_34 = arith.constant dense<0.000000e+00> : vector<8xf32>
    %38 = vector.multi_reduction <add>, %37, %cst_34 [1] : vector<8x8xf32> to vector<8xf32>
    %39 = vector.shape_cast %38 : vector<8xf32> to vector<8x1xf32>
    %40 = tpu.reciprocal %39 {approx = true} : vector<8x1xf32> -> vector<8x1xf32>
    %41 = vector.broadcast %40 : vector<8x1xf32> to vector<8x8xf32>
    %42 = arith.mulf %37, %41 : vector<8x8xf32>
    %cst_35 = arith.constant dense<0.000000e+00> : vector<8x8xf32>
    %43 = tpu.matmul %42, %29, %cst_35 {dimension_numbers = #tpu.dot_dimension_numbers<[1], [0], [0], [1], [0, 0, 1, 1], [], []>} : vector<8x8xf32>, vector<8x8xf32>, vector<8x8xf32> -> vector<8x8xf32>
    %44 = vector.extract_strided_slice %10 {offsets = [0, 0], sizes = [8, 32], strides = [1, 1]} : vector<32x32xf32> to vector<8x32xf32>
    %cst_36 = arith.constant dense<0.000000e+00> : vector<8x32xf32>
    %45 = tpu.matmul %43, %44, %cst_36 {dimension_numbers = #tpu.dot_dimension_numbers<[1], [0], [0], [1], [0, 0, 1, 1], [], []>} : vector<8x8xf32>, vector<8x32xf32>, vector<8x32xf32> -> vector<8x32xf32>
    %46 = vector.extract_strided_slice %11 {offsets = [0, 8], sizes = [8, 8], strides = [1, 1]} : vector<16x32xf32> to vector<8x8xf32>
    %47 = vector.extract_strided_slice %12 {offsets = [0, 8], sizes = [8, 8], strides = [1, 1]} : vector<16x32xf32> to vector<8x8xf32>
    %48 = vector.extract_strided_slice %13 {offsets = [0, 8], sizes = [8, 8], strides = [1, 1]} : vector<16x32xf32> to vector<8x8xf32>
    %49 = tpu.transpose %47, [1, 0] : vector<8x8xf32> -> vector<8x8xf32>
    %cst_37 = arith.constant dense<0.000000e+00> : vector<8x8xf32>
    %50 = tpu.matmul %46, %49, %cst_37 {dimension_numbers = #tpu.dot_dimension_numbers<[1], [0], [0], [1], [0, 0, 1, 1], [], []>} : vector<8x8xf32>, vector<8x8xf32>, vector<8x8xf32> -> vector<8x8xf32>
    %51 = arith.addf %50, %26 : vector<8x8xf32>
    %cst_38 = arith.constant dense<0xFF800000> : vector<8xf32>
    %52 = vector.multi_reduction <maximumf>, %51, %cst_38 [1] : vector<8x8xf32> to vector<8xf32>
    %53 = vector.shape_cast %52 : vector<8xf32> to vector<8x1xf32>
    %54 = vector.broadcast %53 : vector<8x1xf32> to vector<8x8xf32>
    %55 = arith.subf %51, %54 : vector<8x8xf32>
    %56 = math.exp %55 : vector<8x8xf32>
    %cst_39 = arith.constant dense<0.000000e+00> : vector<8xf32>
    %57 = vector.multi_reduction <add>, %56, %cst_39 [1] : vector<8x8xf32> to vector<8xf32>
    %58 = vector.shape_cast %57 : vector<8xf32> to vector<8x1xf32>
    %59 = tpu.reciprocal %58 {approx = true} : vector<8x1xf32> -> vector<8x1xf32>
    %60 = vector.broadcast %59 : vector<8x1xf32> to vector<8x8xf32>
    %61 = arith.mulf %56, %60 : vector<8x8xf32>
    %cst_40 = arith.constant dense<0.000000e+00> : vector<8x8xf32>
    %62 = tpu.matmul %61, %48, %cst_40 {dimension_numbers = #tpu.dot_dimension_numbers<[1], [0], [0], [1], [0, 0, 1, 1], [], []>} : vector<8x8xf32>, vector<8x8xf32>, vector<8x8xf32> -> vector<8x8xf32>
    %63 = vector.extract_strided_slice %10 {offsets = [8, 0], sizes = [8, 32], strides = [1, 1]} : vector<32x32xf32> to vector<8x32xf32>
    %cst_41 = arith.constant dense<0.000000e+00> : vector<8x32xf32>
    %64 = tpu.matmul %62, %63, %cst_41 {dimension_numbers = #tpu.dot_dimension_numbers<[1], [0], [0], [1], [0, 0, 1, 1], [], []>} : vector<8x8xf32>, vector<8x32xf32>, vector<8x32xf32> -> vector<8x32xf32>
    %65 = arith.addf %45, %64 : vector<8x32xf32>
    %66 = vector.extract_strided_slice %11 {offsets = [0, 16], sizes = [8, 8], strides = [1, 1]} : vector<16x32xf32> to vector<8x8xf32>
    %67 = vector.extract_strided_slice %12 {offsets = [0, 16], sizes = [8, 8], strides = [1, 1]} : vector<16x32xf32> to vector<8x8xf32>
    %68 = vector.extract_strided_slice %13 {offsets = [0, 16], sizes = [8, 8], strides = [1, 1]} : vector<16x32xf32> to vector<8x8xf32>
    %69 = tpu.transpose %67, [1, 0] : vector<8x8xf32> -> vector<8x8xf32>
    %cst_42 = arith.constant dense<0.000000e+00> : vector<8x8xf32>
    %70 = tpu.matmul %66, %69, %cst_42 {dimension_numbers = #tpu.dot_dimension_numbers<[1], [0], [0], [1], [0, 0, 1, 1], [], []>} : vector<8x8xf32>, vector<8x8xf32>, vector<8x8xf32> -> vector<8x8xf32>
    %71 = arith.addf %70, %26 : vector<8x8xf32>
    %cst_43 = arith.constant dense<0xFF800000> : vector<8xf32>
    %72 = vector.multi_reduction <maximumf>, %71, %cst_43 [1] : vector<8x8xf32> to vector<8xf32>
    %73 = vector.shape_cast %72 : vector<8xf32> to vector<8x1xf32>
    %74 = vector.broadcast %73 : vector<8x1xf32> to vector<8x8xf32>
    %75 = arith.subf %71, %74 : vector<8x8xf32>
    %76 = math.exp %75 : vector<8x8xf32>
    %cst_44 = arith.constant dense<0.000000e+00> : vector<8xf32>
    %77 = vector.multi_reduction <add>, %76, %cst_44 [1] : vector<8x8xf32> to vector<8xf32>
    %78 = vector.shape_cast %77 : vector<8xf32> to vector<8x1xf32>
    %79 = tpu.reciprocal %78 {approx = true} : vector<8x1xf32> -> vector<8x1xf32>
    %80 = vector.broadcast %79 : vector<8x1xf32> to vector<8x8xf32>
    %81 = arith.mulf %76, %80 : vector<8x8xf32>
    %cst_45 = arith.constant dense<0.000000e+00> : vector<8x8xf32>
    %82 = tpu.matmul %81, %68, %cst_45 {dimension_numbers = #tpu.dot_dimension_numbers<[1], [0], [0], [1], [0, 0, 1, 1], [], []>} : vector<8x8xf32>, vector<8x8xf32>, vector<8x8xf32> -> vector<8x8xf32>
    %83 = vector.extract_strided_slice %10 {offsets = [16, 0], sizes = [8, 32], strides = [1, 1]} : vector<32x32xf32> to vector<8x32xf32>
    %cst_46 = arith.constant dense<0.000000e+00> : vector<8x32xf32>
    %84 = tpu.matmul %82, %83, %cst_46 {dimension_numbers = #tpu.dot_dimension_numbers<[1], [0], [0], [1], [0, 0, 1, 1], [], []>} : vector<8x8xf32>, vector<8x32xf32>, vector<8x32xf32> -> vector<8x32xf32>
    %85 = arith.addf %65, %84 : vector<8x32xf32>
    %86 = vector.extract_strided_slice %11 {offsets = [0, 24], sizes = [8, 8], strides = [1, 1]} : vector<16x32xf32> to vector<8x8xf32>
    %87 = vector.extract_strided_slice %12 {offsets = [0, 24], sizes = [8, 8], strides = [1, 1]} : vector<16x32xf32> to vector<8x8xf32>
    %88 = vector.extract_strided_slice %13 {offsets = [0, 24], sizes = [8, 8], strides = [1, 1]} : vector<16x32xf32> to vector<8x8xf32>
    %89 = tpu.transpose %87, [1, 0] : vector<8x8xf32> -> vector<8x8xf32>
    %cst_47 = arith.constant dense<0.000000e+00> : vector<8x8xf32>
    %90 = tpu.matmul %86, %89, %cst_47 {dimension_numbers = #tpu.dot_dimension_numbers<[1], [0], [0], [1], [0, 0, 1, 1], [], []>} : vector<8x8xf32>, vector<8x8xf32>, vector<8x8xf32> -> vector<8x8xf32>
    %91 = arith.addf %90, %26 : vector<8x8xf32>
    %cst_48 = arith.constant dense<0xFF800000> : vector<8xf32>
    %92 = vector.multi_reduction <maximumf>, %91, %cst_48 [1] : vector<8x8xf32> to vector<8xf32>
    %93 = vector.shape_cast %92 : vector<8xf32> to vector<8x1xf32>
    %94 = vector.broadcast %93 : vector<8x1xf32> to vector<8x8xf32>
    %95 = arith.subf %91, %94 : vector<8x8xf32>
    %96 = math.exp %95 : vector<8x8xf32>
    %cst_49 = arith.constant dense<0.000000e+00> : vector<8xf32>
    %97 = vector.multi_reduction <add>, %96, %cst_49 [1] : vector<8x8xf32> to vector<8xf32>
    %98 = vector.shape_cast %97 : vector<8xf32> to vector<8x1xf32>
    %99 = tpu.reciprocal %98 {approx = true} : vector<8x1xf32> -> vector<8x1xf32>
    %100 = vector.broadcast %99 : vector<8x1xf32> to vector<8x8xf32>
    %101 = arith.mulf %96, %100 : vector<8x8xf32>
    %cst_50 = arith.constant dense<0.000000e+00> : vector<8x8xf32>
    %102 = tpu.matmul %101, %88, %cst_50 {dimension_numbers = #tpu.dot_dimension_numbers<[1], [0], [0], [1], [0, 0, 1, 1], [], []>} : vector<8x8xf32>, vector<8x8xf32>, vector<8x8xf32> -> vector<8x8xf32>
    %103 = vector.extract_strided_slice %10 {offsets = [24, 0], sizes = [8, 32], strides = [1, 1]} : vector<32x32xf32> to vector<8x32xf32>
    %cst_51 = arith.constant dense<0.000000e+00> : vector<8x32xf32>
    %104 = tpu.matmul %102, %103, %cst_51 {dimension_numbers = #tpu.dot_dimension_numbers<[1], [0], [0], [1], [0, 0, 1, 1], [], []>} : vector<8x8xf32>, vector<8x32xf32>, vector<8x32xf32> -> vector<8x32xf32>
    %105 = arith.addf %85, %104 : vector<8x32xf32>
    %c1_52 = arith.constant 1 : index
    %c0_53 = arith.constant 0 : index
    %c0_54 = arith.constant 0 : index
    %106 = vector.load %arg3[%c1_52, %c0_53, %c0_54] : memref<2x8x8xf32, #tpu.memory_space<vmem>>, vector<1x8x8xf32>
    %107 = vector.shape_cast %106 : vector<1x8x8xf32> to vector<8x8xf32>
    %cst_55 = arith.constant 0.000000e+00 : f32
    %108 = vector.broadcast %cst_55 : f32 to vector<8x8xf32>
    %109 = arith.cmpf oeq, %107, %108 : vector<8x8xf32>
    %cst_56 = arith.constant -1.000000e+20 : f32
    %cst_57 = arith.constant 0.000000e+00 : f32
    %110 = vector.broadcast %cst_56 : f32 to vector<8x8xf32>
    %111 = vector.broadcast %cst_57 : f32 to vector<8x8xf32>
    %112 = arith.select %109, %110, %111 : vector<8x8xi1>, vector<8x8xf32>
    %113 = vector.extract_strided_slice %11 {offsets = [8, 0], sizes = [8, 8], strides = [1, 1]} : vector<16x32xf32> to vector<8x8xf32>
    %114 = vector.extract_strided_slice %12 {offsets = [8, 0], sizes = [8, 8], strides = [1, 1]} : vector<16x32xf32> to vector<8x8xf32>
    %115 = vector.extract_strided_slice %13 {offsets = [8, 0], sizes = [8, 8], strides = [1, 1]} : vector<16x32xf32> to vector<8x8xf32>
    %116 = tpu.transpose %114, [1, 0] : vector<8x8xf32> -> vector<8x8xf32>
    %cst_58 = arith.constant dense<0.000000e+00> : vector<8x8xf32>
    %117 = tpu.matmul %113, %116, %cst_58 {dimension_numbers = #tpu.dot_dimension_numbers<[1], [0], [0], [1], [0, 0, 1, 1], [], []>} : vector<8x8xf32>, vector<8x8xf32>, vector<8x8xf32> -> vector<8x8xf32>
    %118 = arith.addf %117, %112 : vector<8x8xf32>
    %cst_59 = arith.constant dense<0xFF800000> : vector<8xf32>
    %119 = vector.multi_reduction <maximumf>, %118, %cst_59 [1] : vector<8x8xf32> to vector<8xf32>
    %120 = vector.shape_cast %119 : vector<8xf32> to vector<8x1xf32>
    %121 = vector.broadcast %120 : vector<8x1xf32> to vector<8x8xf32>
    %122 = arith.subf %118, %121 : vector<8x8xf32>
    %123 = math.exp %122 : vector<8x8xf32>
    %cst_60 = arith.constant dense<0.000000e+00> : vector<8xf32>
    %124 = vector.multi_reduction <add>, %123, %cst_60 [1] : vector<8x8xf32> to vector<8xf32>
    %125 = vector.shape_cast %124 : vector<8xf32> to vector<8x1xf32>
    %126 = tpu.reciprocal %125 {approx = true} : vector<8x1xf32> -> vector<8x1xf32>
    %127 = vector.broadcast %126 : vector<8x1xf32> to vector<8x8xf32>
    %128 = arith.mulf %123, %127 : vector<8x8xf32>
    %cst_61 = arith.constant dense<0.000000e+00> : vector<8x8xf32>
    %129 = tpu.matmul %128, %115, %cst_61 {dimension_numbers = #tpu.dot_dimension_numbers<[1], [0], [0], [1], [0, 0, 1, 1], [], []>} : vector<8x8xf32>, vector<8x8xf32>, vector<8x8xf32> -> vector<8x8xf32>
    %130 = vector.extract_strided_slice %10 {offsets = [0, 0], sizes = [8, 32], strides = [1, 1]} : vector<32x32xf32> to vector<8x32xf32>
    %cst_62 = arith.constant dense<0.000000e+00> : vector<8x32xf32>
    %131 = tpu.matmul %129, %130, %cst_62 {dimension_numbers = #tpu.dot_dimension_numbers<[1], [0], [0], [1], [0, 0, 1, 1], [], []>} : vector<8x8xf32>, vector<8x32xf32>, vector<8x32xf32> -> vector<8x32xf32>
    %132 = vector.extract_strided_slice %11 {offsets = [8, 8], sizes = [8, 8], strides = [1, 1]} : vector<16x32xf32> to vector<8x8xf32>
    %133 = vector.extract_strided_slice %12 {offsets = [8, 8], sizes = [8, 8], strides = [1, 1]} : vector<16x32xf32> to vector<8x8xf32>
    %134 = vector.extract_strided_slice %13 {offsets = [8, 8], sizes = [8, 8], strides = [1, 1]} : vector<16x32xf32> to vector<8x8xf32>
    %135 = tpu.transpose %133, [1, 0] : vector<8x8xf32> -> vector<8x8xf32>
    %cst_63 = arith.constant dense<0.000000e+00> : vector<8x8xf32>
    %136 = tpu.matmul %132, %135, %cst_63 {dimension_numbers = #tpu.dot_dimension_numbers<[1], [0], [0], [1], [0, 0, 1, 1], [], []>} : vector<8x8xf32>, vector<8x8xf32>, vector<8x8xf32> -> vector<8x8xf32>
    %137 = arith.addf %136, %112 : vector<8x8xf32>
    %cst_64 = arith.constant dense<0xFF800000> : vector<8xf32>
    %138 = vector.multi_reduction <maximumf>, %137, %cst_64 [1] : vector<8x8xf32> to vector<8xf32>
    %139 = vector.shape_cast %138 : vector<8xf32> to vector<8x1xf32>
    %140 = vector.broadcast %139 : vector<8x1xf32> to vector<8x8xf32>
    %141 = arith.subf %137, %140 : vector<8x8xf32>
    %142 = math.exp %141 : vector<8x8xf32>
    %cst_65 = arith.constant dense<0.000000e+00> : vector<8xf32>
    %143 = vector.multi_reduction <add>, %142, %cst_65 [1] : vector<8x8xf32> to vector<8xf32>
    %144 = vector.shape_cast %143 : vector<8xf32> to vector<8x1xf32>
    %145 = tpu.reciprocal %144 {approx = true} : vector<8x1xf32> -> vector<8x1xf32>
    %146 = vector.broadcast %145 : vector<8x1xf32> to vector<8x8xf32>
    %147 = arith.mulf %142, %146 : vector<8x8xf32>
    %cst_66 = arith.constant dense<0.000000e+00> : vector<8x8xf32>
    %148 = tpu.matmul %147, %134, %cst_66 {dimension_numbers = #tpu.dot_dimension_numbers<[1], [0], [0], [1], [0, 0, 1, 1], [], []>} : vector<8x8xf32>, vector<8x8xf32>, vector<8x8xf32> -> vector<8x8xf32>
    %149 = vector.extract_strided_slice %10 {offsets = [8, 0], sizes = [8, 32], strides = [1, 1]} : vector<32x32xf32> to vector<8x32xf32>
    %cst_67 = arith.constant dense<0.000000e+00> : vector<8x32xf32>
    %150 = tpu.matmul %148, %149, %cst_67 {dimension_numbers = #tpu.dot_dimension_numbers<[1], [0], [0], [1], [0, 0, 1, 1], [], []>} : vector<8x8xf32>, vector<8x32xf32>, vector<8x32xf32> -> vector<8x32xf32>
    %151 = arith.addf %131, %150 : vector<8x32xf32>
    %152 = vector.extract_strided_slice %11 {offsets = [8, 16], sizes = [8, 8], strides = [1, 1]} : vector<16x32xf32> to vector<8x8xf32>
    %153 = vector.extract_strided_slice %12 {offsets = [8, 16], sizes = [8, 8], strides = [1, 1]} : vector<16x32xf32> to vector<8x8xf32>
    %154 = vector.extract_strided_slice %13 {offsets = [8, 16], sizes = [8, 8], strides = [1, 1]} : vector<16x32xf32> to vector<8x8xf32>
    %155 = tpu.transpose %153, [1, 0] : vector<8x8xf32> -> vector<8x8xf32>
    %cst_68 = arith.constant dense<0.000000e+00> : vector<8x8xf32>
    %156 = tpu.matmul %152, %155, %cst_68 {dimension_numbers = #tpu.dot_dimension_numbers<[1], [0], [0], [1], [0, 0, 1, 1], [], []>} : vector<8x8xf32>, vector<8x8xf32>, vector<8x8xf32> -> vector<8x8xf32>
    %157 = arith.addf %156, %112 : vector<8x8xf32>
    %cst_69 = arith.constant dense<0xFF800000> : vector<8xf32>
    %158 = vector.multi_reduction <maximumf>, %157, %cst_69 [1] : vector<8x8xf32> to vector<8xf32>
    %159 = vector.shape_cast %158 : vector<8xf32> to vector<8x1xf32>
    %160 = vector.broadcast %159 : vector<8x1xf32> to vector<8x8xf32>
    %161 = arith.subf %157, %160 : vector<8x8xf32>
    %162 = math.exp %161 : vector<8x8xf32>
    %cst_70 = arith.constant dense<0.000000e+00> : vector<8xf32>
    %163 = vector.multi_reduction <add>, %162, %cst_70 [1] : vector<8x8xf32> to vector<8xf32>
    %164 = vector.shape_cast %163 : vector<8xf32> to vector<8x1xf32>
    %165 = tpu.reciprocal %164 {approx = true} : vector<8x1xf32> -> vector<8x1xf32>
    %166 = vector.broadcast %165 : vector<8x1xf32> to vector<8x8xf32>
    %167 = arith.mulf %162, %166 : vector<8x8xf32>
    %cst_71 = arith.constant dense<0.000000e+00> : vector<8x8xf32>
    %168 = tpu.matmul %167, %154, %cst_71 {dimension_numbers = #tpu.dot_dimension_numbers<[1], [0], [0], [1], [0, 0, 1, 1], [], []>} : vector<8x8xf32>, vector<8x8xf32>, vector<8x8xf32> -> vector<8x8xf32>
    %169 = vector.extract_strided_slice %10 {offsets = [16, 0], sizes = [8, 32], strides = [1, 1]} : vector<32x32xf32> to vector<8x32xf32>
    %cst_72 = arith.constant dense<0.000000e+00> : vector<8x32xf32>
    %170 = tpu.matmul %168, %169, %cst_72 {dimension_numbers = #tpu.dot_dimension_numbers<[1], [0], [0], [1], [0, 0, 1, 1], [], []>} : vector<8x8xf32>, vector<8x32xf32>, vector<8x32xf32> -> vector<8x32xf32>
    %171 = arith.addf %151, %170 : vector<8x32xf32>
    %172 = vector.extract_strided_slice %11 {offsets = [8, 24], sizes = [8, 8], strides = [1, 1]} : vector<16x32xf32> to vector<8x8xf32>
    %173 = vector.extract_strided_slice %12 {offsets = [8, 24], sizes = [8, 8], strides = [1, 1]} : vector<16x32xf32> to vector<8x8xf32>
    %174 = vector.extract_strided_slice %13 {offsets = [8, 24], sizes = [8, 8], strides = [1, 1]} : vector<16x32xf32> to vector<8x8xf32>
    %175 = tpu.transpose %173, [1, 0] : vector<8x8xf32> -> vector<8x8xf32>
    %cst_73 = arith.constant dense<0.000000e+00> : vector<8x8xf32>
    %176 = tpu.matmul %172, %175, %cst_73 {dimension_numbers = #tpu.dot_dimension_numbers<[1], [0], [0], [1], [0, 0, 1, 1], [], []>} : vector<8x8xf32>, vector<8x8xf32>, vector<8x8xf32> -> vector<8x8xf32>
    %177 = arith.addf %176, %112 : vector<8x8xf32>
    %cst_74 = arith.constant dense<0xFF800000> : vector<8xf32>
    %178 = vector.multi_reduction <maximumf>, %177, %cst_74 [1] : vector<8x8xf32> to vector<8xf32>
    %179 = vector.shape_cast %178 : vector<8xf32> to vector<8x1xf32>
    %180 = vector.broadcast %179 : vector<8x1xf32> to vector<8x8xf32>
    %181 = arith.subf %177, %180 : vector<8x8xf32>
    %182 = math.exp %181 : vector<8x8xf32>
    %cst_75 = arith.constant dense<0.000000e+00> : vector<8xf32>
    %183 = vector.multi_reduction <add>, %182, %cst_75 [1] : vector<8x8xf32> to vector<8xf32>
    %184 = vector.shape_cast %183 : vector<8xf32> to vector<8x1xf32>
    %185 = tpu.reciprocal %184 {approx = true} : vector<8x1xf32> -> vector<8x1xf32>
    %186 = vector.broadcast %185 : vector<8x1xf32> to vector<8x8xf32>
    %187 = arith.mulf %182, %186 : vector<8x8xf32>
    %cst_76 = arith.constant dense<0.000000e+00> : vector<8x8xf32>
    %188 = tpu.matmul %187, %174, %cst_76 {dimension_numbers = #tpu.dot_dimension_numbers<[1], [0], [0], [1], [0, 0, 1, 1], [], []>} : vector<8x8xf32>, vector<8x8xf32>, vector<8x8xf32> -> vector<8x8xf32>
    %189 = vector.extract_strided_slice %10 {offsets = [24, 0], sizes = [8, 32], strides = [1, 1]} : vector<32x32xf32> to vector<8x32xf32>
    %cst_77 = arith.constant dense<0.000000e+00> : vector<8x32xf32>
    %190 = tpu.matmul %188, %189, %cst_77 {dimension_numbers = #tpu.dot_dimension_numbers<[1], [0], [0], [1], [0, 0, 1, 1], [], []>} : vector<8x8xf32>, vector<8x32xf32>, vector<8x32xf32> -> vector<8x32xf32>
    %191 = arith.addf %171, %190 : vector<8x32xf32>
    %192 = tpu.concatenate %105, %191 in 0 : vector<8x32xf32>, vector<8x32xf32> -> vector<16x32xf32>
    %193 = vector.broadcast %14 : vector<1x32xf32> to vector<16x32xf32>
    %194 = arith.addf %192, %193 : vector<16x32xf32>
    %195 = arith.addf %194, %0 : vector<16x32xf32>
    %cst_78 = arith.constant dense<0.000000e+00> : vector<16xf32>
    %196 = vector.multi_reduction <add>, %195, %cst_78 [1] : vector<16x32xf32> to vector<16xf32>
    %197 = vector.shape_cast %196 : vector<16xf32> to vector<16x1xf32>
    %cst_79 = arith.constant 3.200000e+01 : f32
    %198 = vector.broadcast %cst_79 : f32 to vector<16x1xf32>
    %199 = arith.divf %197, %198 : vector<16x1xf32>
    %200 = vector.broadcast %199 : vector<16x1xf32> to vector<16x32xf32>
    %201 = arith.subf %195, %200 : vector<16x32xf32>
    %202 = arith.mulf %201, %201 : vector<16x32xf32>
    %cst_80 = arith.constant dense<0.000000e+00> : vector<16xf32>
    %203 = vector.multi_reduction <add>, %202, %cst_80 [1] : vector<16x32xf32> to vector<16xf32>
    %204 = vector.shape_cast %203 : vector<16xf32> to vector<16x1xf32>
    %cst_81 = arith.constant 3.200000e+01 : f32
    %205 = vector.broadcast %cst_81 : f32 to vector<16x1xf32>
    %206 = arith.divf %204, %205 : vector<16x1xf32>
    %cst_82 = arith.constant 9.99999974E-6 : f32
    %207 = vector.broadcast %cst_82 : f32 to vector<16x1xf32>
    %208 = arith.addf %206, %207 : vector<16x1xf32>
    %209 = math.rsqrt %208 : vector<16x1xf32>
    %210 = vector.broadcast %209 : vector<16x1xf32> to vector<16x32xf32>
    %211 = arith.mulf %201, %210 : vector<16x32xf32>
    %212 = vector.broadcast %15 : vector<1x32xf32> to vector<16x32xf32>
    %213 = arith.mulf %211, %212 : vector<16x32xf32>
    %214 = vector.broadcast %16 : vector<1x32xf32> to vector<16x32xf32>
    %215 = arith.addf %213, %214 : vector<16x32xf32>
    %c0_83 = arith.constant 0 : index
    %c0_84 = arith.constant 0 : index
    %216 = vector.load %arg5[%c0_83, %c0_84] : memref<32x128xf32, #tpu.memory_space<vmem>>, vector<32x128xf32>
    %cst_85 = arith.constant dense<0.000000e+00> : vector<16x128xf32>
    %217 = tpu.matmul %215, %216, %cst_85 {dimension_numbers = #tpu.dot_dimension_numbers<[1], [0], [0], [1], [0, 0, 1, 1], [], []>} : vector<16x32xf32>, vector<32x128xf32>, vector<16x128xf32> -> vector<16x128xf32>
    %c0_86 = arith.constant 0 : index
    %c0_87 = arith.constant 0 : index
    %218 = vector.load %arg8[%c0_86, %c0_87] : memref<1x128xf32, #tpu.memory_space<vmem>>, vector<1x128xf32>
    %219 = vector.broadcast %218 : vector<1x128xf32> to vector<16x128xf32>
    %220 = arith.addf %217, %219 : vector<16x128xf32>
    %cst_88 = arith.constant 0.000000e+00 : f32
    %221 = vector.broadcast %cst_88 : f32 to vector<16x128xf32>
    %222 = arith.maximumf %220, %221 : vector<16x128xf32>
    %c0_89 = arith.constant 0 : index
    %c0_90 = arith.constant 0 : index
    %223 = vector.load %arg6[%c0_89, %c0_90] : memref<128x32xf32, #tpu.memory_space<vmem>>, vector<128x32xf32>
    %cst_91 = arith.constant dense<0.000000e+00> : vector<16x32xf32>
    %224 = tpu.matmul %222, %223, %cst_91 {dimension_numbers = #tpu.dot_dimension_numbers<[1], [0], [0], [1], [0, 0, 1, 1], [], []>} : vector<16x128xf32>, vector<128x32xf32>, vector<16x32xf32> -> vector<16x32xf32>
    %225 = vector.broadcast %17 : vector<1x32xf32> to vector<16x32xf32>
    %226 = arith.addf %224, %225 : vector<16x32xf32>
    %227 = arith.addf %226, %215 : vector<16x32xf32>
    %cst_92 = arith.constant dense<0.000000e+00> : vector<16xf32>
    %228 = vector.multi_reduction <add>, %227, %cst_92 [1] : vector<16x32xf32> to vector<16xf32>
    %229 = vector.shape_cast %228 : vector<16xf32> to vector<16x1xf32>
    %cst_93 = arith.constant 3.200000e+01 : f32
    %230 = vector.broadcast %cst_93 : f32 to vector<16x1xf32>
    %231 = arith.divf %229, %230 : vector<16x1xf32>
    %232 = vector.broadcast %231 : vector<16x1xf32> to vector<16x32xf32>
    %233 = arith.subf %227, %232 : vector<16x32xf32>
    %234 = arith.mulf %233, %233 : vector<16x32xf32>
    %cst_94 = arith.constant dense<0.000000e+00> : vector<16xf32>
    %235 = vector.multi_reduction <add>, %234, %cst_94 [1] : vector<16x32xf32> to vector<16xf32>
    %236 = vector.shape_cast %235 : vector<16xf32> to vector<16x1xf32>
    %cst_95 = arith.constant 3.200000e+01 : f32
    %237 = vector.broadcast %cst_95 : f32 to vector<16x1xf32>
    %238 = arith.divf %236, %237 : vector<16x1xf32>
    %cst_96 = arith.constant 9.99999974E-6 : f32
    %239 = vector.broadcast %cst_96 : f32 to vector<16x1xf32>
    %240 = arith.addf %238, %239 : vector<16x1xf32>
    %241 = math.rsqrt %240 : vector<16x1xf32>
    %242 = vector.broadcast %241 : vector<16x1xf32> to vector<16x32xf32>
    %243 = arith.mulf %233, %242 : vector<16x32xf32>
    %244 = vector.broadcast %18 : vector<1x32xf32> to vector<16x32xf32>
    %245 = arith.mulf %243, %244 : vector<16x32xf32>
    %246 = vector.broadcast %19 : vector<1x32xf32> to vector<16x32xf32>
    %247 = arith.addf %245, %246 : vector<16x32xf32>
    %c0_97 = arith.constant 0 : index
    %c0_98 = arith.constant 0 : index
    %248 = vector.load %arg9[%c0_97, %c0_98] : memref<16x32xf32, #tpu.memory_space<vmem>>, vector<16x32xf32>
    tpu.vector_store %arg9[%c0_97, %c0_98], %247 {strides = array<i32>} : memref<16x32xf32, #tpu.memory_space<vmem>>, vector<16x32xf32>,
    return
  }
}

</mosaic_0001>

<bundles_post_ra>
// kernel: transformer_block.1
= control target key start
LH: loop header
LB: loop body
LE: loop exit
PB: predicated region body
PF: predicated region fallthrough
CT: control target
= control target key end

     0   :  { %14 = vsyncpa [#allocation3], 0  ;;  %s3525_s0 = inlined_call_operand.vmem [shape: f32[16,32], index: 0, kind: input, shape index: {}]   ;;  %s3526_s1 = inlined_call_operand.hbm [shape: f32[16,32], index: 1, kind: input, shape index: {}]   ;;  %s3527_s2 = inlined_call_operand.hbm [shape: f32[16,32], index: 2, kind: input, shape index: {}]   ;;  %s3528_s3 = inlined_call_operand.hbm [shape: f32[2,8,8], index: 3, kind: input, shape index: {}]   ;;  %s3529_s4 = inlined_call_operand.vmem [shape: f32[4,32,32], index: 4, kind: input, shape index: {}]   ;;  %s3530_s5 = inlined_call_operand.vmem [shape: f32[32,128], index: 5, kind: input, shape index: {}]   ;;  %s3531_s6 = inlined_call_operand.vmem [shape: f32[128,32], index: 6, kind: input, shape index: {}]   ;;  %s3532_s7 = inlined_call_operand.hbm [shape: f32[6,32], index: 7, kind: input, shape index: {}]   ;;  %s3533_s8 = inlined_call_operand.vmem [shape: f32[1,128], index: 8, kind: input, shape index: {}]   ;;  %s3534_s9 = inlined_call_operand.hbm [shape: f32[16,32], index: 9, kind: output, shape index: {}]  }
   0x1   :  { %15 = vsyncpa [#allocation6], 0 }
   0x2   :  { %16 = vsyncpa [#allocation9], 0 }
   0x3   :  { %17 = vsyncpa [#allocation4], 0  ;;  %s3074_s30 = smov [#allocation5]   ;;  %s3075_s11 = smov [#allocation2]  }
   0x4   :  { %s37_s10 = sshll.u32 %s3074_s30, 4  ;;  %s25_s12 = sshll.u32 %s3075_s11, 4  ;;  %s38_s10 = int_to_ptr.vmem [resolvable:$true] %s37_s10  ;;  %s26_s12 = int_to_ptr.vmem [resolvable:$true] %s25_s12 }
   0x5   :  { %s2974_s13 = scalar_lea.vmem %s38_s10, 256  ;;  %p2979_p1 = scmp.lt.s32.totalorder %s38_s10, %s38_s10 }
   0x6   :  { %p2975_p0 = scmp.ne.s32.totalorder %s38_s10, %s2974_s13  ;;  %p2980_p2 = scmp.lt.s32.totalorder %s2974_s13, %s2974_s13 }
   0x8   :  { %p2981_p3 = por %p2980_p2, %p2979_p1 }
   0xa   :  { %p2982_p4 = pnand %p2981_p3, %p2975_p0 }
   0xc   :  { %2985 = shalt.err (!%p2982_p4)
}
   0xd   :  { %s3076_s14 = smov 128   ;;  %s3077_s15 = smov 8  }
   0xe   :  { %43 = dma.hbm_to_vmem [thread:$0]  %s3527_s2, 256, %s38_s10, [#allocation6], %s3076_s14, %s3076_s14, %s3077_s15  }
   0xf   :  { %s2994_s18 = scalar_lea.vmem %s26_s12, 256  ;;  %p2999_p6 = scmp.lt.s32.totalorder %s26_s12, %s26_s12 }
  0x10   :  { %p2995_p5 = scmp.ne.s32.totalorder %s26_s12, %s2994_s18  ;;  %p3000_p7 = scmp.lt.s32.totalorder %s2994_s18, %s2994_s18 }
  0x12   :  { %p3001_p8 = por %p3000_p7, %p2999_p6 }
  0x14   :  { %p3002_p9 = pnand %p3001_p8, %p2995_p5 }
  0x16   :  { %3005 = shalt.err (!%p3002_p9)
}
  0x17   :  { %31 = dma.hbm_to_vmem [thread:$0]  %s3526_s1, 256, %s26_s12, [#allocation3], %s3076_s14, %s3076_s14, %s3077_s15  }
  0x18   :  { %s3078_s21 = smov [#allocation7]   ;;  %s3079_s23 = smov [#allocation8]  }
  0x19   :  { %s49_s22 = sshll.u32 %s3078_s21, 4  ;;  %s68_s24 = sshll.u32 %s3079_s23, 4  ;;  %s50_s22 = int_to_ptr.vmem [resolvable:$true] %s49_s22  ;;  %s69_s24 = int_to_ptr.vmem [resolvable:$true] %s68_s24 }
  0x1a   :  { %s3014_s2 = scalar_lea.vmem %s50_s22, 256  ;;  %p3019_p11 = scmp.lt.s32.totalorder %s50_s22, %s50_s22 }
  0x1b   :  { %p3015_p10 = scmp.ne.s32.totalorder %s50_s22, %s3014_s2  ;;  %p3020_p12 = scmp.lt.s32.totalorder %s3014_s2, %s3014_s2 }
  0x1d   :  { %p3021_p13 = por %p3020_p12, %p3019_p11 }
  0x1f   :  { %p3022_p0 = pnand %p3021_p13, %p3015_p10 }
  0x21   :  { %3025 = shalt.err (!%p3022_p0)
}
  0x22   :  { %55 = dma.hbm_to_vmem [thread:$0]  %s3528_s3, 256, %s50_s22, [#allocation6], %s3076_s14, %s3076_s14, %s3077_s15  }
  0x23   :  { %s3034_s1 = scalar_lea.vmem %s69_s24, 128  ;;  %p3039_p2 = scmp.lt.s32.totalorder %s69_s24, %s69_s24 }
  0x24   :  { %p3035_p1 = scmp.ne.s32.totalorder %s69_s24, %s3034_s1  ;;  %p3040_p3 = scmp.lt.s32.totalorder %s3034_s1, %s3034_s1 }
  0x26   :  { %p3041_p4 = por %p3040_p3, %p3039_p2 }
  0x28   :  { %p3042_p5 = pnand %p3041_p4, %p3035_p1 }
  0x2a   :  { %3045 = shalt.err (!%p3042_p5)
}
  0x2b   :  { %71 = dma.hbm_to_vmem [thread:$0]  %s3532_s7, 128, %s69_s24, [#allocation9]  }
  0x2c   :  { %3066 = dma.done.wait [#allocation3], 256  }
  0x2d   :  { %3067 = vsyncadd [#allocation3], 4294967040 }
  0x2e   :  { %3068 = dma.done.wait [#allocation6], 512  }
  0x2f   :  { %3069 = vsyncadd [#allocation6], 4294966784 }
  0x30   :  { %3070 = dma.done.wait [#allocation9], 128  }
  0x31   :  { %3071 = vsyncadd [#allocation9], 4294967168  ;;  %vm111_vm0 = vcmask 261120   ;;  %v95_v0 = vld [vmem:[%s3529_s4 + $0x18] sm:$0xff]  ;;  %v94_v1 = vld [vmem:[%s3529_s4 + $0x10] sm:$0xff]  ;;  %v3080_v18 = vmov 0.0  }
  0x32   :  { %2715 = vmatprep.subr.mxu0 %v95_v0  ;;  %v3166_v2 = vld [vmem:[%s3525_s0] sm:$0xff]  ;;  %v93_v3 = vld [vmem:[%s3529_s4 + $0x8] sm:$0xff]  ;;  %v2569_v6 = vld [vmem:[%s3529_s4 + $0x38] sm:$0xff]  ;;  %2753 = vmatprep.subr.mxu1 %v3080_v18  ;;  %vm3081_vm1 = vmmov 0   ;;  %vm364_vm2 = vcmask 64512   ;;  %s3082_s11 = smov 120  }
  0x33   :  { %2716 = vmatpush3.msra.mxu0 %v95_v0  ;;  %2723 = vmatprep.mubr.msk.f32.mxu0 %vm111_vm0, %v3166_v2  ;;  %v92_v4 = vld [vmem:[%s3529_s4] sm:$0xff]  ;;  %v3179_v5 = vld [vmem:[%s3525_s0 + $0x8] sm:$0xff]  ;;  %v2568_v8 = vld [vmem:[%s3529_s4 + $0x30] sm:$0xff]  ;;  %s3083_s12 = smov 112   ;;  %s3084_s18 = smov 104  }
  0x34   :  { %2717 = vmatprep.subr.mxu0 %v94_v1  ;;  %v88_v7 = vld [vmem:[#allocation2] sm:$0xff]  ;;  %v2567_v9 = vld [vmem:[%s3529_s4 + $0x28] sm:$0xff]  ;;  %v2573_v12 = vld [vmem:[%s3529_s4 + $0x58] sm:$0xff]  ;;  %2755 = vmatprep.mubr.msk.f32.mxu1 %vm3081_vm1, %v3080_v18 }
  0x35   :  { %2718 = vmatpush3.msra.mxu0 %v94_v1  ;;  %v2566_v10 = vld [vmem:[%s3529_s4 + $0x20] sm:$0xff]  ;;  %v89_v11 = vld [vmem:[#allocation2 + $0x8] sm:$0xff]  ;;  %v2572_v13 = vld [vmem:[%s3529_s4 + $0x50] sm:$0xff] }
  0x36   :  { %2719 = vmatprep.subr.mxu0 %v93_v3  ;;  %v2571_v14 = vld [vmem:[%s3529_s4 + $0x48] sm:$0xff]  ;;  %v2570_v15 = vld [vmem:[%s3529_s4 + $0x40] sm:$0xff]  ;;  %v90_v16 = vld [vmem:[#allocation5] sm:$0xff] }
  0x37   :  { %2720 = vmatpush3.msra.mxu0 %v93_v3  ;;  %v91_v17 = vld [vmem:[#allocation5 + $0x8] sm:$0xff]  ;;  %v361_v27 = vld [vmem:[#allocation7] sm:$0xff]  ;;  %v3270_v50 = vld [vmem:[%s3529_s4 + $0x68] sm:$0xff] }
  0x38   :  { %2721 = vmatprep.subr.mxu0 %v92_v4  ;;  %vm362_vm3 = vcmp.eq.f32.partialorder %v361_v27, 0.0  ;;  %v3278_v55 = vld [vmem:[%s3529_s4 + $0x60] sm:$0xff] }
  0x39   :  { %2722 = vmatpush3.msra.mxu0 %v92_v4  ;;  %v3248_v28 = vsel %vm362_vm3, -1e+20, %v3080_v18 }
  0x3a   :  { %2724 = vmatmul.mubr.msk.f32.vlgmr.msra.gmra.mxu0 %vm111_vm0, %v3179_v5  ;;  %2726 = vmatprep.subr.mxu0 %v2569_v6 }
  0x3b   :  { %2727 = vmatpush3.msra.mxu0 %v2569_v6  ;;  %2734 = vmatprep.mubr.msk.f32.mxu0 %vm111_vm0, %v88_v7 }
  0x3c   :  { %2728 = vmatprep.subr.mxu0 %v2568_v8 }
  0x3d   :  { %2729 = vmatpush3.msra.mxu0 %v2568_v8 }
  0x3e   :  { %2730 = vmatprep.subr.mxu0 %v2567_v9 }
  0x3f   :  { %2731 = vmatpush3.msra.mxu0 %v2567_v9 }
  0x40   :  { %2732 = vmatprep.subr.mxu0 %v2566_v10 }
  0x41   :  { %2733 = vmatpush3.msra.mxu0 %v2566_v10 }
  0x42   :  { %2735 = vmatmul.mubr.msk.f32.vlgmr.msra.gmra.mxu0 %vm111_vm0, %v89_v11  ;;  %2737 = vmatprep.subr.mxu0 %v2573_v12 }
  0x43   :  { %2738 = vmatpush3.msra.mxu0 %v2573_v12  ;;  %2745 = vmatprep.mubr.msk.f32.mxu0 %vm111_vm0, %v90_v16 }
  0x44   :  { %2739 = vmatprep.subr.mxu0 %v2572_v13 }
  0x45   :  { %2740 = vmatpush3.msra.mxu0 %v2572_v13 }
  0x46   :  { %2741 = vmatprep.subr.mxu0 %v2571_v14 }
  0x47   :  { %2742 = vmatpush3.msra.mxu0 %v2571_v14  ;;  %v3311_v14 = vld [vmem:[%s3529_s4 + $0x70] sm:$0xff] }
  0x48   :  { %2743 = vmatprep.subr.mxu0 %v2570_v15 }
  0x49   :  { %2744 = vmatpush3.msra.mxu0 %v2570_v15 }
  0x4a   :  { %2746 = vmatmul.mubr.msk.f32.vlgmr.msra.gmra.mxu0 %vm111_vm0, %v91_v17  ;;  %2748 = vmatprep.subr.mxu0 %v3080_v18 }
  0x4b   :  { %2750 = vmatprep.mubr.msk.f32.mxu0 %vm3081_vm1, %v3080_v18 }
  0xfa   :  { %v3217_v19 = vpop.f32.mrf.mxu0 }
  0xfc   :  { %v3219_v20 = vpop.f32.mrf.mxu0 }
 0x102   :  { %v3221_v21 = vpop.f32.mrf.mxu0 }
 0x104   :  { %v3223_v22 = vpop.f32.mrf.mxu0 }
 0x105   :  { %527 = vrot.lane.b32.xlu0 %v3223_v22, %s3082_s11  ;;  %2749 = vmatpush3.xpose.msk.msra.mxu0 %vm364_vm2, %v3223_v22 }
 0x106   :  { %2758 = vmatprep.subr.mxu0 %v3080_v18 }
 0x108   :  { %2751 = vmatmul.mubr.msk.f32.vlgmr.msra.gmra.mxu0 %vm364_vm2, %v3219_v20 }
 0x109   :  { %525 = vrot.lane.b32.xlu0 %v3219_v20, %s3082_s11  ;;  %2760 = vmatprep.mubr.msk.f32.mxu0 %vm3081_vm1, %v3080_v18 }
 0x10a   :  { %v3236_v23 = vpop.f32.mrf.mxu0 }
 0x10c   :  { %v3238_v24 = vpop.f32.mrf.mxu0 }
 0x10d   :  { %2754 = vmatpush3.msra.mxu1 %v3238_v24 }
 0x10e   :  { %2763 = vmatprep.subr.mxu1 %v3080_v18 }
 0x177   :  { %v528_v25 = vpop.permute.xlu0 %527 }
 0x178   :  { %2759 = vmatpush3.xpose.msk.msra.mxu0 %vm364_vm2, %v528_v25 }
 0x179   :  { %2768 = vmatprep.subr.mxu0 %v3080_v18 }
 0x17b   :  { %v526_v26 = vpop.permute.xlu0 %525 }
 0x17c   :  { %2761 = vmatmul.mubr.msk.f32.vlgmr.msra.gmra.mxu0 %vm364_vm2, %v526_v26 }
 0x17d   :  { %2770 = vmatprep.mubr.msk.f32.mxu0 %vm3081_vm1, %v3080_v18  ;;  %2769 = vmatpush3.msra.mxu0 %v3270_v50 }
 0x17e   :  { %2778 = vmatprep.subr.mxu0 %v3080_v18 }
 0x1c8   :  { %v437_v29 = vpop.f32.mrf.mxu0 }
 0x1c9   :  { %v438_v30 = vadd.f32 %v437_v29, %v3248_v28 }
 0x1ca   :  { %v2752_v31 = vpop.f32.mrf.mxu0 }
 0x1cb   :  { %v441_v32 = vsel %vm364_vm2, %v438_v30, -inf }
 0x1cc   :  { %442 = vmax.xlane.f32.xlu1 %v441_v32 }
 0x23c   :  { %v599_v33 = vpop.f32.mrf.mxu0 }
 0x23d   :  { %v600_v34 = vadd.f32 %v599_v33, %v3248_v28 }
 0x23e   :  { %v2762_v35 = vpop.f32.mrf.mxu0 }
 0x23f   :  { %v603_v36 = vsel %vm364_vm2, %v600_v34, -inf }
 0x240   :  { %604 = vmax.xlane.f32.xlu1 %v603_v36 }
 0x255   :  { %v443_v37 = vpop.xlane.xlu1 %442 }
 0x256   :  { %v444_v38 = vsub.f32 %v438_v30, %v443_v37 }
 0x258   :  { %v445_v39 = vmul.f32 1.442695, %v444_v38 }
 0x25a   :  { %2926 = vpow2.f32 %v445_v39 }
 0x267   :  { %v2927_v40 = vpop.eup %2926 }
 0x268   :  { %v447_v41 = vsel %vm364_vm2, %v2927_v40, 0.0 }
 0x269   :  { %448 = vadd.xlane.f32.xlu0 %v447_v41 }
 0x27f   :  { %926 = vrot.lane.b32.xlu0 %v3238_v24, %s3083_s12 }
 0x2c9   :  { %v605_v42 = vpop.xlane.xlu1 %604 }
 0x2ca   :  { %v606_v43 = vsub.f32 %v600_v34, %v605_v42 }
 0x2cc   :  { %v607_v44 = vmul.f32 1.442695, %v606_v43 }
 0x2ce   :  { %2928 = vpow2.f32 %v607_v44 }
 0x2db   :  { %v2929_v45 = vpop.eup %2928 }
 0x2dc   :  { %v609_v46 = vsel %vm364_vm2, %v2929_v45, 0.0 }
 0x2dd   :  { %610 = vadd.xlane.f32.xlu1 %v609_v46  ;;  %v1316_v46 = vld [vmem:[#allocation7 + $0x8] sm:$0xff] }
 0x2de   :  { %vm1317_vm4 = vcmp.eq.f32.partialorder %v1316_v46, 0.0 }
 0x2ee   :  { %615 = vrot.lane.b32.xlu1 %v3238_v24, %s3082_s11 }
 0x2f2   :  { %v449_v47 = vpop.xlane.xlu0 %448  ;;  %839 = vrot.lane.b32.xlu1 %v3223_v22, %s3083_s12 }
 0x2f3   :  { %2930 = vrcp.f32 %v449_v47 }
 0x2f6   :  { %837 = vrot.lane.b32.xlu1 %v3219_v20, %s3083_s12  ;;  %v927_v57 = vpop.permute.xlu0 %926 }
 0x300   :  { %v2931_v48 = vpop.eup %2930 }
 0x301   :  { %v451_v49 = vmul.f32 %v2931_v48, %v2927_v40 }
 0x303   :  { %2756 = vmatmul.mubr.msk.f32.vlgmr.msra.gmra.mxu1 %vm364_vm2, %v451_v49  ;;  %v3359_v49 = vsel %vm1317_vm4, -1e+20, %v3080_v18 }
 0x304   :  { %2765 = vmatprep.mubr.msk.f32.mxu1 %vm3081_vm1, %v3080_v18 }
 0x366   :  { %v611_v51 = vpop.xlane.xlu1 %610 }
 0x367   :  { %2932 = vrcp.f32 %v611_v51 }
 0x36a   :  { %v616_v52 = vpop.permute.xlu1 %615 }
 0x36b   :  { %2764 = vmatpush3.msra.mxu1 %v616_v52 }
 0x36c   :  { %2773 = vmatprep.subr.mxu1 %v3080_v18 }
 0x36e   :  { %v840_v59 = vpop.permute.xlu1 %839 }
 0x372   :  { %v838_v62 = vpop.permute.xlu1 %837 }
 0x374   :  { %v2933_v53 = vpop.eup %2932 }
 0x375   :  { %v613_v54 = vmul.f32 %v2933_v53, %v2929_v45 }
 0x377   :  { %2766 = vmatmul.mubr.msk.f32.vlgmr.msra.gmra.mxu1 %vm364_vm2, %v613_v54 }
 0x378   :  { %2774 = vmatpush3.msra.mxu1 %v3278_v55  ;;  %2775 = vmatprep.mubr.msk.f32.mxu1 %vm3081_vm1, %v3080_v18 }
 0x379   :  { %2783 = vmatprep.subr.mxu1 %v3080_v18 }
 0x3c3   :  { %v521_v56 = vpop.f32.mrf.mxu1 }
 0x3c4   :  { %2776 = vmatmul.mubr.msk.f32.vlgmr.msra.gmra.mxu1 %vm364_vm2, %v521_v56 }
 0x3c5   :  { %2784 = vmatpush3.msra.mxu1 %v927_v57  ;;  %v2757_v58 = vpop.f32.mrf.mxu1  ;;  %2785 = vmatprep.mubr.msk.f32.mxu1 %vm3081_vm1, %v3080_v18 }
 0x3c6   :  { %2793 = vmatprep.subr.mxu1 %v3080_v18 }
 0x437   :  { %v687_v60 = vpop.f32.mrf.mxu1 }
 0x438   :  { %2771 = vmatmul.mubr.msk.f32.vlgmr.msra.gmra.mxu0 %vm364_vm2, %v687_v60 }
 0x439   :  { %2779 = vmatpush3.xpose.msk.msra.mxu0 %vm364_vm2, %v840_v59  ;;  %v2767_v61 = vpop.f32.mrf.mxu1  ;;  %2780 = vmatprep.mubr.msk.f32.mxu0 %vm3081_vm1, %v3080_v18 }
 0x43a   :  { %2788 = vmatprep.subr.mxu0 %v3080_v18 }
 0x43c   :  { %2781 = vmatmul.mubr.msk.f32.vlgmr.msra.gmra.mxu0 %vm364_vm2, %v838_v62 }
 0x43d   :  { %2790 = vmatprep.mubr.msk.f32.mxu0 %vm3081_vm1, %v3080_v18  ;;  %2789 = vmatpush3.msra.mxu0 %v3311_v14 }
 0x43e   :  { %2798 = vmatprep.subr.mxu0 %v3080_v18 }
 0x484   :  { %v833_v63 = vpop.f32.mrf.mxu1 }
 0x486   :  { %v2777_v0 = vpop.f32.mrf.mxu1 }
 0x4f8   :  { %v760_v1 = vpop.f32.mrf.mxu0 }
 0x4f9   :  { %v834_v37 = vadd.f32 %v833_v63, %v760_v1 }
 0x4fa   :  { %v2772_v3 = vpop.f32.mrf.mxu0 }
 0x4fc   :  { %v911_v4 = vpop.f32.mrf.mxu0 }
 0x4fd   :  { %v912_v6 = vadd.f32 %v911_v4, %v3248_v28 }
 0x4fe   :  { %v2782_v7 = vpop.f32.mrf.mxu0 }
 0x4ff   :  { %v915_v8 = vsel %vm364_vm2, %v912_v6, -inf }
 0x500   :  { %916 = vmax.xlane.f32.xlu1 %v915_v8 }
 0x511   :  { %1165 = vrot.lane.b32.xlu1 %v3238_v24, %s3084_s18 }
 0x515   :  { %1481 = vrot.lane.b32.xlu1 %v3221_v21, %s3082_s11 }
 0x589   :  { %v917_v9 = vpop.xlane.xlu1 %916 }
 0x58a   :  { %v918_v10 = vsub.f32 %v912_v6, %v917_v9 }
 0x58c   :  { %v919_v11 = vmul.f32 1.442695, %v918_v10 }
 0x58d   :  { %v1166_v25 = vpop.permute.xlu1 %1165 }
 0x58e   :  { %2934 = vpow2.f32 %v919_v11 }
 0x591   :  { %v1482_v41 = vpop.permute.xlu1 %1481 }
 0x59b   :  { %v2935_v12 = vpop.eup %2934 }
 0x59c   :  { %v921_v13 = vsel %vm364_vm2, %v2935_v12, 0.0 }
 0x59d   :  { %922 = vadd.xlane.f32.xlu0 %v921_v13 }
 0x5b3   :  { %1078 = vrot.lane.b32.xlu0 %v3223_v22, %s3084_s18 }
 0x5b7   :  { %1076 = vrot.lane.b32.xlu0 %v3219_v20, %s3084_s18 }
 0x626   :  { %v923_v15 = vpop.xlane.xlu0 %922 }
 0x627   :  { %2936 = vrcp.f32 %v923_v15 }
 0x62a   :  { %v1079_v17 = vpop.permute.xlu0 %1078 }
 0x62e   :  { %v1077_v20 = vpop.permute.xlu0 %1076 }
 0x634   :  { %v2937_v16 = vpop.eup %2936 }
 0x635   :  { %v925_v24 = vmul.f32 %v2937_v16, %v2935_v12 }
 0x637   :  { %2786 = vmatmul.mubr.msk.f32.vlgmr.msra.gmra.mxu1 %vm364_vm2, %v925_v24 }
 0x638   :  { %2794 = vmatpush3.xpose.msk.msra.mxu1 %vm364_vm2, %v1079_v17  ;;  %2795 = vmatprep.mubr.msk.f32.mxu1 %vm3081_vm1, %v3080_v18 }
 0x639   :  { %2803 = vmatprep.subr.mxu1 %v3080_v18 }
 0x63b   :  { %2796 = vmatmul.mubr.msk.f32.vlgmr.msra.gmra.mxu1 %vm364_vm2, %v1077_v20 }
 0x63c   :  { %2805 = vmatprep.mubr.msk.f32.mxu1 %vm3081_vm1, %v3080_v18 }
 0x6f7   :  { %v998_v22 = vpop.f32.mrf.mxu1 }
 0x6f8   :  { %2791 = vmatmul.mubr.msk.f32.vlgmr.msra.gmra.mxu0 %vm364_vm2, %v998_v22 }
 0x6f9   :  { %2799 = vmatpush3.msra.mxu0 %v1166_v25  ;;  %v2787_v26 = vpop.f32.mrf.mxu1  ;;  %2800 = vmatprep.mubr.msk.f32.mxu0 %vm3081_vm1, %v3080_v18 }
 0x6fa   :  { %2808 = vmatprep.subr.mxu0 %v3080_v18 }
 0x6fb   :  { %v1150_v27 = vpop.f32.mrf.mxu1 }
 0x6fc   :  { %v1151_v29 = vadd.f32 %v1150_v27, %v3248_v28  ;;  %v3335_v28 = vld [vmem:[%s3529_s4 + $0x78] sm:$0xff] }
 0x6fd   :  { %v2797_v30 = vpop.f32.mrf.mxu1  ;;  %2804 = vmatpush3.msra.mxu1 %v3335_v28 }
 0x6fe   :  { %v1154_v31 = vsel %vm364_vm2, %v1151_v29, -inf  ;;  %2813 = vmatprep.subr.mxu1 %v3080_v18 }
 0x6ff   :  { %1155 = vmax.xlane.f32.xlu0 %v1154_v31 }
 0x788   :  { %v1156_v32 = vpop.xlane.xlu0 %1155 }
 0x789   :  { %v1157_v33 = vsub.f32 %v1151_v29, %v1156_v32 }
 0x78b   :  { %v1158_v34 = vmul.f32 1.442695, %v1157_v33 }
 0x78d   :  { %2938 = vpow2.f32 %v1158_v34 }
 0x79a   :  { %v2939_v35 = vpop.eup %2938 }
 0x79b   :  { %v1160_v36 = vsel %vm364_vm2, %v2939_v35, 0.0 }
 0x79c   :  { %1161 = vadd.xlane.f32.xlu1 %v1160_v36 }
 0x7ad   :  { %1479 = vrot.lane.b32.xlu1 %v3217_v19, %s3082_s11 }
 0x7b8   :  { %v1071_v38 = vpop.f32.mrf.mxu0 }
 0x7b9   :  { %v1075_v39 = vadd.f32 %v1071_v38, %v834_v37 }
 0x7ba   :  { %v2792_v40 = vpop.f32.mrf.mxu0 }
 0x825   :  { %v1162_v42 = vpop.xlane.xlu1 %1161 }
 0x826   :  { %2940 = vrcp.f32 %v1162_v42 }
 0x829   :  { %v1480_v45 = vpop.permute.xlu1 %1479 }
 0x833   :  { %v2941_v43 = vpop.eup %2940 }
 0x834   :  { %v1164_v44 = vmul.f32 %v2941_v43, %v2939_v35 }
 0x836   :  { %2801 = vmatmul.mubr.msk.f32.vlgmr.msra.gmra.mxu0 %vm364_vm2, %v1164_v44 }
 0x837   :  { %2809 = vmatpush3.xpose.msk.msra.mxu0 %vm364_vm2, %v3221_v21  ;;  %2810 = vmatprep.mubr.msk.f32.mxu0 %vm3081_vm1, %v3080_v18 }
 0x838   :  { %2818 = vmatprep.subr.mxu0 %v3080_v18 }
 0x83a   :  { %2811 = vmatmul.mubr.msk.f32.vlgmr.msra.gmra.mxu0 %vm364_vm2, %v3217_v19 }
 0x83b   :  { %2819 = vmatpush3.xpose.msk.msra.mxu0 %vm364_vm2, %v1482_v41  ;;  %2820 = vmatprep.mubr.msk.f32.mxu0 %vm3081_vm1, %v3080_v18 }
 0x83c   :  { %2828 = vmatprep.subr.mxu0 %v3080_v18 }
 0x83e   :  { %2821 = vmatmul.mubr.msk.f32.vlgmr.msra.gmra.mxu0 %vm364_vm2, %v1480_v45 }
 0x83f   :  { %2829 = vmatpush3.msra.mxu0 %v3270_v50  ;;  %2830 = vmatprep.mubr.msk.f32.mxu0 %vm3081_vm1, %v3080_v18 }
 0x840   :  { %2838 = vmatprep.subr.mxu0 %v3080_v18 }
 0x8f6   :  { %v1237_v47 = vpop.f32.mrf.mxu0 }
 0x8f7   :  { %2806 = vmatmul.mubr.msk.f32.vlgmr.msra.gmra.mxu1 %vm364_vm2, %v1237_v47 }
 0x8f8   :  { %2814 = vmatpush3.msra.mxu1 %v3236_v23  ;;  %v2802_v48 = vpop.f32.mrf.mxu0  ;;  %2815 = vmatprep.mubr.msk.f32.mxu1 %vm3081_vm1, %v3080_v18 }
 0x8f9   :  { %2823 = vmatprep.subr.mxu1 %v3080_v18 }
 0x8fa   :  { %v1391_v50 = vpop.f32.mrf.mxu0 }
 0x8fb   :  { %v1392_v51 = vadd.f32 %v1391_v50, %v3359_v49 }
 0x8fc   :  { %v2812_v52 = vpop.f32.mrf.mxu0 }
 0x8fd   :  { %v1395_v53 = vsel %vm364_vm2, %v1392_v51, -inf }
 0x8fe   :  { %1396 = vmax.xlane.f32.xlu1 %v1395_v53  ;;  %v1553_v54 = vpop.f32.mrf.mxu0 }
 0x8ff   :  { %v1554_v56 = vadd.f32 %v1553_v54, %v3359_v49 }
 0x900   :  { %v2822_v57 = vpop.f32.mrf.mxu0 }
 0x901   :  { %v1557_v58 = vsel %vm364_vm2, %v1554_v56, -inf }
 0x902   :  { %1558 = vmax.xlane.f32.xlu0 %v1557_v58 }
 0x90f   :  { %1791 = vrot.lane.b32.xlu1 %v3217_v19, %s3083_s12 }
 0x987   :  { %v1397_v59 = vpop.xlane.xlu1 %1396 }
 0x988   :  { %v1398_v60 = vsub.f32 %v1392_v51, %v1397_v59 }
 0x98a   :  { %v1399_v61 = vmul.f32 1.442695, %v1398_v60 }
 0x98b   :  { %v1559_v62 = vpop.xlane.xlu0 %1558 }
 0x98c   :  { %2942 = vpow2.f32 %v1399_v61  ;;  %v1560_v63 = vsub.f32 %v1554_v56, %v1559_v62  ;;  %v2616_v56 = vld [vmem:[#allocation8] ss:$0 sm:$0xff] }
 0x98e   :  { %v1561_v0 = vmul.f32 1.442695, %v1560_v63 }
 0x990   :  { %2944 = vpow2.f32 %v1561_v0 }
 0x999   :  { %v2943_v1 = vpop.eup %2942 }
 0x99a   :  { %v1401_v3 = vsel %vm364_vm2, %v2943_v1, 0.0 }
 0x99b   :  { %1402 = vadd.xlane.f32.xlu0 %v1401_v3 }
 0x99d   :  { %v2945_v4 = vpop.eup %2944 }
 0x99e   :  { %v1563_v6 = vsel %vm364_vm2, %v2945_v4, 0.0 }
 0x99f   :  { %1564 = vadd.xlane.f32.xlu0 %v1563_v6 }
 0x9b5   :  { %1569 = vrot.lane.b32.xlu0 %v3236_v23, %s3082_s11 }
 0x9b7   :  { %v1310_v7 = vpop.f32.mrf.mxu1 }
 0x9b8   :  { %v3374_v8 = vadd.f32 %v1310_v7, %v1075_v39 }
 0x9b9   :  { %v2807_v9 = vpop.f32.mrf.mxu1  ;;  %1793 = vrot.lane.b32.xlu0 %v3221_v21, %s3083_s12 }
 0x9ba   :  { %v2273_v57 = vadd.f32 %v2616_v56, %v3374_v8 }
 0xa24   :  { %v1403_v10 = vpop.xlane.xlu0 %1402 }
 0xa25   :  { %2946 = vrcp.f32 %v1403_v10 }
 0xa28   :  { %v1565_v11 = vpop.xlane.xlu0 %1564 }
 0xa29   :  { %2948 = vrcp.f32 %v1565_v11  ;;  %v3432_v11 = vld [vmem:[#allocation8 + $0x1] ss:$0 sm:$0xff] }
 0xa2c   :  { %v1570_v15 = vpop.permute.xlu0 %1569 }
 0xa30   :  { %v1794_v25 = vpop.permute.xlu0 %1793 }
 0xa32   :  { %v2947_v12 = vpop.eup %2946 }
 0xa33   :  { %v1405_v13 = vmul.f32 %v2947_v12, %v2943_v1 }
 0xa35   :  { %2816 = vmatmul.mubr.msk.f32.vlgmr.msra.gmra.mxu1 %vm364_vm2, %v1405_v13  ;;  %v3434_v13 = vld [vmem:[#allocation8 + $0x2] ss:$0 sm:$0xff] }
 0xa36   :  { %v2949_v16 = vpop.eup %2948  ;;  %2824 = vmatpush3.msra.mxu1 %v1570_v15  ;;  %2825 = vmatprep.mubr.msk.f32.mxu1 %vm3081_vm1, %v3080_v18 }
 0xa37   :  { %v1567_v17 = vmul.f32 %v2949_v16, %v2945_v4  ;;  %2833 = vmatprep.subr.mxu1 %v3080_v18 }
 0xa39   :  { %2826 = vmatmul.mubr.msk.f32.vlgmr.msra.gmra.mxu1 %vm364_vm2, %v1567_v17 }
 0xa3a   :  { %2834 = vmatpush3.msra.mxu1 %v3278_v55  ;;  %2835 = vmatprep.mubr.msk.f32.mxu1 %vm3081_vm1, %v3080_v18  ;;  %v1792_v55 = vpop.permute.xlu1 %1791 }
 0xa3b   :  { %2843 = vmatprep.subr.mxu1 %v3080_v18 }
 0xaf5   :  { %v1475_v24 = vpop.f32.mrf.mxu1 }
 0xaf6   :  { %2836 = vmatmul.mubr.msk.f32.vlgmr.msra.gmra.mxu1 %vm364_vm2, %v1475_v24 }
 0xaf7   :  { %v2817_v20 = vpop.f32.mrf.mxu1  ;;  %2845 = vmatprep.mubr.msk.f32.mxu1 %vm3081_vm1, %v3080_v18 }
 0xaf9   :  { %v1641_v22 = vpop.f32.mrf.mxu1 }
 0xafa   :  { %2831 = vmatmul.mubr.msk.f32.vlgmr.msra.gmra.mxu0 %vm364_vm2, %v1641_v22 }
 0xafb   :  { %2839 = vmatpush3.xpose.msk.msra.mxu0 %vm364_vm2, %v1794_v25  ;;  %v2827_v26 = vpop.f32.mrf.mxu1  ;;  %2840 = vmatprep.mubr.msk.f32.mxu0 %vm3081_vm1, %v3080_v18 }
 0xafc   :  { %2848 = vmatprep.subr.mxu0 %v3080_v18 }
 0xafe   :  { %2841 = vmatmul.mubr.msk.f32.vlgmr.msra.gmra.mxu0 %vm364_vm2, %v1792_v55 }
 0xaff   :  { %2849 = vmatpush3.msra.mxu0 %v3311_v14  ;;  %2850 = vmatprep.mubr.msk.f32.mxu0 %vm3081_vm1, %v3080_v18 }
 0xb00   :  { %2858 = vmatprep.subr.mxu0 %v3080_v18 }
 0xbb6   :  { %v1787_v27 = vpop.f32.mrf.mxu1 }
 0xbb8   :  { %v2837_v29 = vpop.f32.mrf.mxu1 }
 0xbba   :  { %v1714_v30 = vpop.f32.mrf.mxu0 }
 0xbbb   :  { %v1788_v31 = vadd.f32 %v1787_v27, %v1714_v30 }
 0xbbc   :  { %v2832_v32 = vpop.f32.mrf.mxu0 }
 0xbbe   :  { %v1865_v33 = vpop.f32.mrf.mxu0 }
 0xbbf   :  { %v1866_v34 = vadd.f32 %v1865_v33, %v3359_v49 }
 0xbc0   :  { %v2842_v35 = vpop.f32.mrf.mxu0 }
 0xbc1   :  { %v1869_v36 = vsel %vm364_vm2, %v1866_v34, -inf  ;;  %v2317_v35 = vld [vmem:[%s3530_s5 + $0x8] sm:$0xff] }
 0xbc2   :  { %1870 = vmax.xlane.f32.xlu0 %v1869_v36  ;;  %v2316_v36 = vld [vmem:[%s3530_s5] sm:$0xff] }
 0xbd8   :  { %1880 = vrot.lane.b32.xlu0 %v3236_v23, %s3083_s12 }
 0xbdc   :  { %2030 = vrot.lane.b32.xlu0 %v3217_v19, %s3084_s18 }
 0xc4b   :  { %v1871_v14 = vpop.xlane.xlu0 %1870 }
 0xc4c   :  { %v1872_v37 = vsub.f32 %v1866_v34, %v1871_v14  ;;  %v2319_v34 = vld [vmem:[%s3530_s5 + $0x18] sm:$0xff] }
 0xc4d   :  { %v2425_v14 = vld [vmem:[%s3531_s6 + $0x78] sm:$0xff] }
 0xc4e   :  { %v1873_v38 = vmul.f32 1.442695, %v1872_v37  ;;  %v2424_v37 = vld [vmem:[%s3531_s6 + $0x70] sm:$0xff] }
 0xc4f   :  { %v1881_v39 = vpop.permute.xlu0 %1880 }
 0xc50   :  { %2950 = vpow2.f32 %v1873_v38  ;;  %2844 = vmatpush3.msra.mxu1 %v1881_v39  ;;  %v2423_v38 = vld [vmem:[%s3531_s6 + $0x68] sm:$0xff]  ;;  %v2422_v39 = vld [vmem:[%s3531_s6 + $0x60] sm:$0xff] }
 0xc51   :  { %2853 = vmatprep.subr.mxu1 %v3080_v18 }
 0xc53   :  { %v2031_v45 = vpop.permute.xlu0 %2030 }
 0xc5d   :  { %v2951_v40 = vpop.eup %2950 }
 0xc5e   :  { %v1875_v41 = vsel %vm364_vm2, %v2951_v40, 0.0 }
 0xc5f   :  { %1876 = vadd.xlane.f32.xlu1 %v1875_v41  ;;  %v2420_v41 = vld [vmem:[%s3531_s6 + $0x50] sm:$0xff] }
 0xc70   :  { %2032 = vrot.lane.b32.xlu1 %v3221_v21, %s3084_s18 }
 0xce8   :  { %v1877_v42 = vpop.xlane.xlu1 %1876 }
 0xce9   :  { %2952 = vrcp.f32 %v1877_v42  ;;  %v2419_v42 = vld [vmem:[%s3531_s6 + $0x48] sm:$0xff] }
 0xcec   :  { %v2033_v19 = vpop.permute.xlu1 %2032 }
 0xcf6   :  { %v2953_v43 = vpop.eup %2952 }
 0xcf7   :  { %v1879_v44 = vmul.f32 %v2953_v43, %v2951_v40  ;;  %v2421_v40 = vld [vmem:[%s3531_s6 + $0x58] sm:$0xff]  ;;  %v2418_v43 = vld [vmem:[%s3531_s6 + $0x40] sm:$0xff] }
 0xcf9   :  { %2846 = vmatmul.mubr.msk.f32.vlgmr.msra.gmra.mxu1 %vm364_vm2, %v1879_v44  ;;  %v2417_v44 = vld [vmem:[%s3531_s6 + $0x38] sm:$0xff] }
 0xcfa   :  { %2854 = vmatpush3.xpose.msk.msra.mxu1 %vm364_vm2, %v2033_v19  ;;  %2855 = vmatprep.mubr.msk.f32.mxu1 %vm3081_vm1, %v3080_v18  ;;  %v2416_v19 = vld [vmem:[%s3531_s6 + $0x30] sm:$0xff] }
 0xcfb   :  { %2863 = vmatprep.subr.mxu1 %v3080_v18 }
 0xcfd   :  { %2856 = vmatmul.mubr.msk.f32.vlgmr.msra.gmra.mxu1 %vm364_vm2, %v2031_v45  ;;  %v2415_v45 = vld [vmem:[%s3531_s6 + $0x28] sm:$0xff] }
 0xcfe   :  { %2864 = vmatpush3.msra.mxu1 %v3335_v28  ;;  %2865 = vmatprep.mubr.msk.f32.mxu1 %vm3081_vm1, %v3080_v18 }
 0xcff   :  { %2879 = vmatprep.subr.mxu1 %v2425_v14 }
 0xdb9   :  { %v1952_v21 = vpop.f32.mrf.mxu1 }
 0xdba   :  { %2851 = vmatmul.mubr.msk.f32.vlgmr.msra.gmra.mxu0 %vm364_vm2, %v1952_v21  ;;  %v2414_v21 = vld [vmem:[%s3531_s6 + $0x20] sm:$0xff] }
 0xdbb   :  { %v2847_v46 = vpop.f32.mrf.mxu1  ;;  %2860 = vmatprep.mubr.msk.f32.mxu0 %vm3081_vm1, %v3080_v18 }
 0xdbd   :  { %v2104_v47 = vpop.f32.mrf.mxu1 }
 0xdbe   :  { %v2105_v48 = vadd.f32 %v2104_v47, %v3359_v49  ;;  %v2275_v49 = vadd.f32 %v2273_v57, %v3166_v2  ;;  %v2410_v57 = vld [vmem:[%s3531_s6] sm:$0xff] }
 0xdbf   :  { %v2857_v50 = vpop.f32.mrf.mxu1 }
 0xdc0   :  { %v2108_v51 = vsel %vm364_vm2, %v2105_v48, -inf  ;;  %v2277_v59 = vsel %vm111_vm0, %v2275_v49, 0.0 }
 0xdc1   :  { %2109 = vmax.xlane.f32.xlu0 %v2108_v51 }
 0xdd7   :  { %2119 = vrot.lane.b32.xlu0 %v3236_v23, %s3084_s18 }
 0xe4a   :  { %v2110_v28 = vpop.xlane.xlu0 %2109 }
 0xe4b   :  { %v2111_v52 = vsub.f32 %v2105_v48, %v2110_v28 }
 0xe4d   :  { %v2112_v53 = vmul.f32 1.442695, %v2111_v52 }
 0xe4e   :  { %v2120_v54 = vpop.permute.xlu0 %2119 }
 0xe4f   :  { %2954 = vpow2.f32 %v2112_v53  ;;  %2859 = vmatpush3.msra.mxu0 %v2120_v54  ;;  %v2413_v53 = vld [vmem:[%s3531_s6 + $0x18] sm:$0xff]  ;;  %v2412_v54 = vld [vmem:[%s3531_s6 + $0x10] sm:$0xff] }
 0xe50   :  { %2868 = vmatprep.subr.mxu0 %v2319_v34 }
 0xe5c   :  { %v2955_v18 = vpop.eup %2954 }
 0xe5d   :  { %v2114_v58 = vsel %vm364_vm2, %v2955_v18, 0.0 }
 0xe5e   :  { %2115 = vadd.xlane.f32.xlu1 %v2114_v58 }
 0xe62   :  { %2278 = vadd.xlane.f32.xlu1 %v2277_v59 }
 0xe7a   :  { %v2025_v60 = vpop.f32.mrf.mxu0 }
 0xe7b   :  { %v2029_v23 = vadd.f32 %v2025_v60, %v1788_v31 }
 0xe7c   :  { %v2852_v61 = vpop.f32.mrf.mxu0 }
 0xee7   :  { %v2116_v62 = vpop.xlane.xlu1 %2115 }
 0xee8   :  { %2956 = vrcp.f32 %v2116_v62 }
 0xeeb   :  { %v2279_v63 = vpop.xlane.xlu1 %2278 }
 0xeec   :  { %v2284_v0 = vmul.f32 0.03125, %v2279_v63  ;;  %v2622_v63 = vld [vmem:[#allocation8 + $0x3] ss:$0 sm:$0xff] }
 0xeee   :  { %v2286_v1 = vsub.f32 %v2275_v49, %v2284_v0 }
 0xef0   :  { %v2288_v3 = vmul.f32 %v2286_v1, %v2286_v1 }
 0xef2   :  { %v2290_v4 = vsel %vm111_vm0, %v2288_v3, 0.0 }
 0xef3   :  { %2291 = vadd.xlane.f32.xlu0 %v2290_v4 }
 0xef5   :  { %v2957_v6 = vpop.eup %2956 }
 0xef6   :  { %v2118_v7 = vmul.f32 %v2957_v6, %v2955_v18  ;;  %v2619_v18 = vld [vmem:[%s3533_s8] ss:$0 sm:$0xff] }
 0xef8   :  { %2861 = vmatmul.mubr.msk.f32.vlgmr.msra.gmra.mxu0 %vm364_vm2, %v2118_v7 }
 0xef9   :  { %2869 = vmatpush3.msra.mxu0 %v2319_v34 }
 0xf7c   :  { %v2292_v2 = vpop.xlane.xlu0 %2291 }
 0xf7d   :  { %v2296_v8 = vmul.f32 0.03125, %v2292_v2 }
 0xf7f   :  { %v2298_v9 = vadd.f32 1e-05, %v2296_v8 }
 0xf81   :  { %2958 = vrsqrt.f32 %v2298_v9 }
 0xf8e   :  { %v2959_v10 = vpop.eup %2958 }
 0xf8f   :  { %v2302_v12 = vmul.f32 %v2959_v10, %v2286_v1 }
 0xf91   :  { %v2308_v15 = vmul.f32 %v3432_v11, %v2302_v12 }
 0xf93   :  { %v3438_v16 = vadd.f32 %v3434_v13, %v2308_v15 }
 0xf95   :  { %2876 = vmatprep.mubr.msk.f32.mxu0 %vm111_vm0, %v3438_v16 }
 0xfb8   :  { %v2191_v17 = vpop.f32.mrf.mxu0 }
 0xfb9   :  { %2866 = vmatmul.mubr.msk.f32.vlgmr.msra.gmra.mxu1 %vm364_vm2, %v2191_v17 }
 0xfba   :  { %v2862_v24 = vpop.f32.mrf.mxu0  ;;  %2880 = vmatpush3.msra.mxu1 %v2425_v14 }
 0xfbb   :  { %2881 = vmatprep.subr.mxu1 %v2424_v37 }
 0xfbc   :  { %2882 = vmatpush3.msra.mxu1 %v2424_v37 }
 0xfbd   :  { %2883 = vmatprep.subr.mxu1 %v2423_v38 }
 0xfbe   :  { %2884 = vmatpush3.msra.mxu1 %v2423_v38 }
 0xfbf   :  { %2885 = vmatprep.subr.mxu1 %v2422_v39 }
 0xfc0   :  { %2886 = vmatpush3.msra.mxu1 %v2422_v39 }
 0xfc1   :  { %2887 = vmatprep.subr.mxu1 %v2421_v40 }
 0xfc2   :  { %2888 = vmatpush3.msra.mxu1 %v2421_v40 }
 0xfc3   :  { %2889 = vmatprep.subr.mxu1 %v2420_v41 }
 0xfc4   :  { %2890 = vmatpush3.msra.mxu1 %v2420_v41 }
 0xfc5   :  { %2891 = vmatprep.subr.mxu1 %v2419_v42 }
 0xfc6   :  { %2892 = vmatpush3.msra.mxu1 %v2419_v42 }
 0xfc7   :  { %2893 = vmatprep.subr.mxu1 %v2418_v43 }
 0xfc8   :  { %2894 = vmatpush3.msra.mxu1 %v2418_v43 }
 0xfc9   :  { %2895 = vmatprep.subr.mxu1 %v2417_v44 }
 0xfca   :  { %2896 = vmatpush3.msra.mxu1 %v2417_v44 }
 0xfcb   :  { %2897 = vmatprep.subr.mxu1 %v2416_v19 }
 0xfcc   :  { %2898 = vmatpush3.msra.mxu1 %v2416_v19 }
 0xfcd   :  { %2899 = vmatprep.subr.mxu1 %v2415_v45 }
 0xfce   :  { %2900 = vmatpush3.msra.mxu1 %v2415_v45 }
 0xfcf   :  { %2901 = vmatprep.subr.mxu1 %v2414_v21 }
 0xfd0   :  { %2902 = vmatpush3.msra.mxu1 %v2414_v21 }
 0xfd1   :  { %2903 = vmatprep.subr.mxu1 %v2413_v53 }
 0xfd2   :  { %2904 = vmatpush3.msra.mxu1 %v2413_v53 }
 0xfd3   :  { %2905 = vmatprep.subr.mxu1 %v2412_v54 }
 0xfd4   :  { %2906 = vmatpush3.msra.mxu1 %v2412_v54 }
0x1079   :  { %v2264_v20 = vpop.f32.mrf.mxu1 }
0x107a   :  { %v2268_v22 = vadd.f32 %v2264_v20, %v2029_v23 }
0x107b   :  { %v2867_v25 = vpop.f32.mrf.mxu1 }
0x107c   :  { %v2274_v26 = vadd.f32 %v2616_v56, %v2268_v22  ;;  %v2411_v56 = vld [vmem:[%s3531_s6 + $0x8] sm:$0xff]  ;;  %s3085_s6 = smov [#allocation10]  }
0x107d   :  { %2907 = vmatprep.subr.mxu1 %v2411_v56  ;;  %s2552_s8 = sshll.u32 %s3085_s6, 4  ;;  %s2553_s8 = int_to_ptr.vmem [resolvable:$true] %s2552_s8 }
0x107e   :  { %v2276_v55 = vadd.f32 %v2274_v26, %v3179_v5  ;;  %v2318_v5 = vld [vmem:[%s3530_s5 + $0x10] sm:$0xff]  ;;  %2908 = vmatpush3.msra.mxu1 %v2411_v56  ;;  %s3046_s12 = scalar_lea.vmem %s2553_s8, 256  ;;  %p3051_p7 = scmp.lt.s32.totalorder %s2553_s8, %s2553_s8 }
0x107f   :  { %2870 = vmatprep.subr.mxu0 %v2318_v5  ;;  %2909 = vmatprep.subr.mxu1 %v2410_v57  ;;  %p3047_p6 = scmp.ne.s32.totalorder %s2553_s8, %s3046_s12  ;;  %p3052_p8 = scmp.lt.s32.totalorder %s3046_s12, %s3046_s12 }
0x1080   :  { %v2280_v27 = vsel %vm111_vm0, %v2276_v55, 0.0  ;;  %2871 = vmatpush3.msra.mxu0 %v2318_v5  ;;  %2910 = vmatpush3.msra.mxu1 %v2410_v57 }
0x1081   :  { %2281 = vadd.xlane.f32.xlu1 %v2280_v27  ;;  %2872 = vmatprep.subr.mxu0 %v2317_v35  ;;  %p3053_p9 = por %p3052_p8, %p3051_p7 }
0x1082   :  { %2873 = vmatpush3.msra.mxu0 %v2317_v35 }
0x1083   :  { %2874 = vmatprep.subr.mxu0 %v2316_v36  ;;  %p3054_p10 = pnand %p3053_p9, %p3047_p6 }
0x1084   :  { %2875 = vmatpush3.msra.mxu0 %v2316_v36 }
0x110a   :  { %v2282_v29 = vpop.xlane.xlu1 %2281 }
0x110b   :  { %v2285_v30 = vmul.f32 0.03125, %v2282_v29 }
0x110d   :  { %v2287_v31 = vsub.f32 %v2276_v55, %v2285_v30  ;;  %v2623_v30 = vld [vmem:[#allocation8 + $0x4] ss:$0 sm:$0xff] }
0x110f   :  { %v2289_v32 = vmul.f32 %v2287_v31, %v2287_v31 }
0x1111   :  { %v2293_v33 = vsel %vm111_vm0, %v2289_v32, 0.0  ;;  %v2624_v32 = vld [vmem:[#allocation8 + $0x5] ss:$0 sm:$0xff] }
0x1112   :  { %2294 = vadd.xlane.f32.xlu1 %v2293_v33 }
0x119b   :  { %v2295_v46 = vpop.xlane.xlu1 %2294 }
0x119c   :  { %v2297_v47 = vmul.f32 0.03125, %v2295_v46 }
0x119e   :  { %v2299_v48 = vadd.f32 1e-05, %v2297_v47 }
0x11a0   :  { %2960 = vrsqrt.f32 %v2299_v48 }
0x11ad   :  { %v2961_v50 = vpop.eup %2960 }
0x11ae   :  { %v2303_v51 = vmul.f32 %v2961_v50, %v2287_v31 }
0x11b0   :  { %v2309_v28 = vmul.f32 %v3432_v11, %v2303_v51 }
0x11b2   :  { %v2315_v52 = vadd.f32 %v3434_v13, %v2309_v28 }
0x11b4   :  { %2877 = vmatmul.mubr.msk.f32.vlgmr.msra.gmra.mxu0 %vm111_vm0, %v2315_v52 }
0x1274   :  { %v2878_v58 = vpop.f32.mrf.mxu0 }
0x1275   :  { %v2405_v49 = vadd.f32 %v2878_v58, %v2619_v18 }
0x1276   :  { %v2399_v59 = vpop.f32.mrf.mxu0 }
0x1277   :  { %v2400_v60 = vadd.f32 %v2619_v18, %v2399_v59  ;;  %v2409_v61 = vmax.f32 %v2405_v49, 0.0 }
0x1279   :  { %v2408_v23 = vmax.f32 %v2400_v60, 0.0 }
0x127b   :  { %2911 = vmatprep.mubr.f32.mxu1 %v2408_v23 }
0x127c   :  { %2912 = vmatmul.mubr.f32.vlgmr.msra.gmra.mxu1 %v2409_v61 }
0x133c   :  { %v2913_v62 = vpop.f32.mrf.mxu1 }
0x133d   :  { %v2502_v1 = vadd.f32 %v2913_v62, %v2622_v63 }
0x133e   :  { %v2496_v0 = vpop.f32.mrf.mxu1 }
0x133f   :  { %v2497_v3 = vadd.f32 %v2622_v63, %v2496_v0  ;;  %v2506_v7 = vadd.f32 %v2502_v1, %v2315_v52 }
0x1341   :  { %v2505_v4 = vadd.f32 %v2497_v3, %v3438_v16  ;;  %v2510_v2 = vsel %vm111_vm0, %v2506_v7, 0.0 }
0x1343   :  { %v2507_v6 = vsel %vm111_vm0, %v2505_v4, 0.0 }
0x1344   :  { %2508 = vadd.xlane.f32.xlu1 %v2507_v6 }
0x1348   :  { %2511 = vadd.xlane.f32.xlu1 %v2510_v2 }
0x13cd   :  { %v2509_v8 = vpop.xlane.xlu1 %2508 }
0x13ce   :  { %v2513_v9 = vmul.f32 0.03125, %v2509_v8 }
0x13d0   :  { %v2515_v10 = vsub.f32 %v2505_v4, %v2513_v9 }
0x13d1   :  { %v2512_v11 = vpop.xlane.xlu1 %2511 }
0x13d2   :  { %v2514_v12 = vmul.f32 0.03125, %v2512_v11  ;;  %v2517_v13 = vmul.f32 %v2515_v10, %v2515_v10 }
0x13d4   :  { %v2516_v15 = vsub.f32 %v2506_v7, %v2514_v12  ;;  %v2519_v17 = vsel %vm111_vm0, %v2517_v13, 0.0 }
0x13d5   :  { %2520 = vadd.xlane.f32.xlu1 %v2519_v17 }
0x13d6   :  { %v2518_v24 = vmul.f32 %v2516_v15, %v2516_v15 }
0x13d8   :  { %v2522_v16 = vsel %vm111_vm0, %v2518_v24, 0.0 }
0x13d9   :  { %2523 = vadd.xlane.f32.xlu1 %v2522_v16 }
0x145e   :  { %v2521_v20 = vpop.xlane.xlu1 %2520 }
0x145f   :  { %v2525_v22 = vmul.f32 0.03125, %v2521_v20 }
0x1461   :  { %v2527_v25 = vadd.f32 1e-05, %v2525_v22 }
0x1462   :  { %v2524_v26 = vpop.xlane.xlu1 %2523 }
0x1463   :  { %2962 = vrsqrt.f32 %v2527_v25  ;;  %v2526_v55 = vmul.f32 0.03125, %v2524_v26 }
0x1465   :  { %v2528_v27 = vadd.f32 1e-05, %v2526_v55 }
0x1467   :  { %2964 = vrsqrt.f32 %v2528_v27 }
0x1470   :  { %v2963_v29 = vpop.eup %2962 }
0x1471   :  { %v2531_v31 = vmul.f32 %v2963_v29, %v2515_v10 }
0x1473   :  { %v2537_v33 = vmul.f32 %v2623_v30, %v2531_v31 }
0x1474   :  { %v2965_v34 = vpop.eup %2964 }
0x1475   :  { %v2532_v5 = vmul.f32 %v2965_v34, %v2516_v15  ;;  %v2543_v35 = vadd.f32 %v2624_v32, %v2537_v33 }
0x1477   :  { %v2538_v36 = vmul.f32 %v2623_v30, %v2532_v5  ;;  %2545 = vst.msk [vmem:[#allocation10] sm:$0xff] %vm111_vm0, %v2543_v35 }
0x1479   :  { %v2544_v14 = vadd.f32 %v2624_v32, %v2538_v36 }
0x147b   :  { %2546 = vst.msk [vmem:[#allocation10 + $0x8] sm:$0xff] %vm111_vm0, %v2544_v14 }
0x147c   :  { %3057 = shalt.err (!%p3054_p10)
}
0x147d   :  { %2558 = dma.vmem_to_hbm [thread:$0]  %s2553_s8, 256, %s3534_s9, [#allocation4], %s3076_s14, %s3076_s14, %s3077_s15  }
0x147e   :  { %3072 = dma.done.wait [#allocation4], 256  }
0x147f   :  { %3073 = vsyncadd [#allocation4], 4294967040 }
0x1480   :  { %2562 = vsyncpa [#allocation3], 1 }
0x1481   :  { %2563 = vsyncpa [#allocation6], 1 }
0x1482   :  { %2564 = vsyncpa [#allocation9], 1 }
0x1483   :  { %2565 = vsyncpa [#allocation4], 1 }

</bundles_post_ra>
